<compile_context>
chip_gen: v7x
topology: tpu7x:2x2x1
jax: 0.10.0
libtpu: 0.0.40
codegen_flags: <defaults>
</compile_context>

<pallas_src>
from functools import partial

import jax
import jax.numpy as jnp
from jax import lax
from jax.experimental import pallas as pl
from jax.experimental.pallas import tpu as pltpu


# ----------------------------------------------------------------------------
# Fused encoder (Child-Sum TreeLSTM cell, chain traversal, gates [i,f,o,u]) +
# decoder (LSTMCell gates [i,f,g,o] + fc_out, logits fed back) kernel.
# ----------------------------------------------------------------------------
def fused_kernel(x_ref, wx_ref, uh_ref, benc_ref, whh_ref, b0_ref,
                 wdec_ref, bdec_ref, out_ref, xw_scr):
    TB = x_ref.shape[0]          # T * Bp
    S, Bp, _ = out_ref.shape
    H = uh_ref.shape[0]
    G = 4 * H
    T = TB // Bp
    GC = wdec_ref.shape[1]       # 4H + Cp

    # ---------------- encoder ----------------
    uh = uh_ref[...]             # hoisted out of the recurrence

    # Hoisted input-path matmul: all T steps at once (M = T*Bp), bias folded in.
    xw_scr[...] = (
        jnp.dot(x_ref[...], wx_ref[...], preferred_element_type=jnp.float32)
        + benc_ref[...]
    )

    h0 = jnp.zeros((Bp, H), jnp.float32)
    c0 = jnp.zeros((Bp, H), jnp.float32)

    def enc_step(t, carry):
        h, c = carry
        base = pl.multiple_of(t * Bp, Bp)
        gates = (xw_scr[pl.ds(base, Bp), :]
                 + jnp.dot(h, uh, preferred_element_type=jnp.float32))
        i = jax.nn.sigmoid(gates[:, 0 * H:1 * H])
        f = jax.nn.sigmoid(gates[:, 1 * H:2 * H])
        o = jax.nn.sigmoid(gates[:, 2 * H:3 * H])
        u = jnp.tanh(gates[:, 3 * H:4 * H])
        c = i * u + f * c
        h = o * jnp.tanh(c)
        return (h, c)

    enc_h, _ = lax.fori_loop(0, T, enc_step, (h0, c0), unroll=True)

    # ---------------- decoder ----------------
    wdec = wdec_ref[...]                                   # (H, 4H + Cp)
    bdec = jnp.broadcast_to(bdec_ref[...], (Bp, GC))       # broadcast hoisted

    # Step-0 gates: x_0 = 0  =>  gates_0 = enc @ Whh + (bih + bhh)
    gates0 = (jnp.dot(enc_h, whh_ref[...], preferred_element_type=jnp.float32)
              + b0_ref[...])

    def dec_step(t, carry):
        c, gates = carry
        i = jax.nn.sigmoid(gates[:, 0 * H:1 * H])
        f = jax.nn.sigmoid(gates[:, 1 * H:2 * H])
        g = jnp.tanh(gates[:, 2 * H:3 * H])
        o = jax.nn.sigmoid(gates[:, 3 * H:4 * H])
        c = f * c + i * g
        h = o * jnp.tanh(c)
        # One fused MXU push: [ gates_{t+1} | logits_t ]
        comb = jnp.dot(h, wdec, preferred_element_type=jnp.float32) + bdec
        out_ref[t] = comb[:, G:]         # (Bp, Cp) lane-dense store
        return (c, comb[:, :G])

    lax.fori_loop(0, S, dec_step, (c0, gates0), unroll=True)


# ----------------------------------------------------------------------------
# Wrapper: embedding lookup, batch/class padding, decoder weight fusion,
# single fused pallas_call, layout fix-up.
# ----------------------------------------------------------------------------
@partial(jax.jit, static_argnames=("max_output",))
def feature_recognition_logits(tokens, params, max_output):
    emb = params["embedding"]                       # (E, V); embed_size = dim 0
    B, T = tokens.shape
    E = emb.shape[0]
    H = params["enc_uh"].shape[0]
    C = params["dec_wfc"].shape[1]

    Bp = max(8, ((B + 7) // 8) * 8)                 # f32 sublane minimum
    Cp = max(128, ((C + 127) // 128) * 128)         # lane-dense logits

    # Embedding lookup + layout transpose + batch padding (plain JAX glue).
    x_bte = jnp.take(emb.T, tokens, axis=0)         # (B, T, E)
    x_tbe = jnp.transpose(x_bte, (1, 0, 2))         # (T, B, E)
    x_tbe = jnp.pad(x_tbe, ((0, 0), (0, Bp - B), (0, 0)))
    x_flat = x_tbe.reshape(T * Bp, E)               # (T*Bp, E)

    # Decoder weight fusion (class-padded so padded lanes stay exactly zero).
    wih = params["dec_wih"]                         # (C, 4H)
    whh = params["dec_whh"]                         # (H, 4H)
    wfc = params["dec_wfc"]                         # (H, C)
    bfc = params["dec_bfc"]                         # (1, C)
    wih_p = jnp.pad(wih, ((0, Cp - C), (0, 0)))     # (Cp, 4H)
    wfc_p = jnp.pad(wfc, ((0, 0), (0, Cp - C)))     # (H, Cp)
    bfc_p = jnp.pad(bfc, ((0, 0), (0, Cp - C)))     # (1, Cp)

    b0 = params["dec_bih"] + params["dec_bhh"]      # (1, 4H)
    w_fused = jnp.dot(wfc_p, wih_p) + whh           # Wfc@Wih + Whh   (H, 4H)
    b_fused = jnp.dot(bfc_p, wih_p) + b0            # bfc@Wih+bih+bhh (1, 4H)
    w_dec = jnp.concatenate([w_fused, wfc_p], axis=1)   # (H, 4H + Cp)
    b_dec = jnp.concatenate([b_fused, bfc_p], axis=1)   # (1, 4H + Cp)

    vmem = pl.BlockSpec(memory_space=pltpu.MemorySpace.VMEM)
    logits_sbc = pl.pallas_call(
        fused_kernel,
        out_shape=jax.ShapeDtypeStruct((max_output, Bp, Cp), jnp.float32),
        in_specs=[vmem] * 8,
        out_specs=vmem,
        scratch_shapes=[pltpu.VMEM((T * Bp, 4 * H), jnp.float32)],
    )(x_flat, params["enc_wx"], params["enc_uh"], params["enc_b"],
      whh, b0, w_dec, b_dec)

    # (S, Bp, Cp) -> (B, 25, max_output) to match the PyTorch logits shape.
    return jnp.transpose(logits_sbc[:, :B, :C], (1, 2, 0))


def make_params(key, vocab, embed_size, hidden_size, num_classes):
    ks = jax.random.split(key, 10)
    s = 0.1
    return {
        "embedding": s * jax.random.normal(ks[0], (embed_size, vocab), jnp.float32),
        # ChildSumTreeLSTM encoder (gate order i, f, o, u)
        "enc_wx": s * jax.random.normal(ks[1], (embed_size, 4 * hidden_size), jnp.float32),
        "enc_uh": s * jax.random.normal(ks[2], (hidden_size, 4 * hidden_size), jnp.float32),
        "enc_b": s * jax.random.normal(ks[3], (1, 4 * hidden_size), jnp.float32),
        # DecoderRNN: LSTMCell(num_classes, hidden) + Linear(hidden, num_classes)
        "dec_wih": s * jax.random.normal(ks[4], (num_classes, 4 * hidden_size), jnp.float32),
        "dec_whh": s * jax.random.normal(ks[5], (hidden_size, 4 * hidden_size), jnp.float32),
        "dec_bih": s * jax.random.normal(ks[6], (1, 4 * hidden_size), jnp.float32),
        "dec_bhh": s * jax.random.normal(ks[7], (1, 4 * hidden_size), jnp.float32),
        "dec_wfc": s * jax.random.normal(ks[8], (hidden_size, num_classes), jnp.float32),
        "dec_bfc": s * jax.random.normal(ks[9], (1, num_classes), jnp.float32),
    }


if __name__ == "__main__":
    B, T, E, H = 4, 8, 32, 32           # batch, nodes-per-tree, embed, hidden
    C = 25                              # DecoderRNN(25, hidden_size)
    MAX_FEATURES = 5
    MAX_OUTPUT = MAX_FEATURES + 1       # self.max_output
    VOCAB = 50

    key = jax.random.PRNGKey(0)
    k_par, k_tok = jax.random.split(key)
    params = make_params(k_par, VOCAB, E, H, C)
    tokens = jax.random.randint(k_tok, (B, T), 0, VOCAB)   # forest node ids

    logits = feature_recognition_logits(tokens, params, MAX_OUTPUT)
    logits = jax.block_until_ready(logits)
    assert logits.shape == (B, C, MAX_OUTPUT), logits.shape

    # predictions = logits.max(1)[1]  -> argmax over the class axis
    predictions = jax.block_until_ready(jnp.argmax(logits, axis=1))
    assert predictions.shape == (B, MAX_OUTPUT), predictions.shape
    assert bool(jnp.all(jnp.isfinite(logits)))

    print("KERNEL_OK")
</pallas_src>

<mosaic_0001>
module attributes {stable_mosaic.version = 11 : i64} {
  func.func @fused_kernel(%arg0: memref<64x32xf32, #tpu.memory_space<vmem>>, %arg1: memref<32x128xf32, #tpu.memory_space<vmem>>, %arg2: memref<32x128xf32, #tpu.memory_space<vmem>>, %arg3: memref<1x128xf32, #tpu.memory_space<vmem>>, %arg4: memref<32x128xf32, #tpu.memory_space<vmem>>, %arg5: memref<1x128xf32, #tpu.memory_space<vmem>>, %arg6: memref<32x256xf32, #tpu.memory_space<vmem>>, %arg7: memref<1x256xf32, #tpu.memory_space<vmem>>, %arg8: memref<6x8x128xf32, #tpu.memory_space<vmem>>, %arg9: memref<64x128xf32, #tpu.memory_space<vmem>>) attributes {dimension_semantics = [], scalar_prefetch = 0 : i64, scratch_operands = 1 : i64, tpu.core_type = #tpu.core_type<tc>} {
    %c0 = arith.constant 0 : index
    %c0_0 = arith.constant 0 : index
    %0 = vector.load %arg2[%c0, %c0_0] : memref<32x128xf32, #tpu.memory_space<vmem>>, vector<32x128xf32>
    %c0_1 = arith.constant 0 : index
    %c0_2 = arith.constant 0 : index
    %1 = vector.load %arg0[%c0_1, %c0_2] : memref<64x32xf32, #tpu.memory_space<vmem>>, vector<64x32xf32>
    %c0_3 = arith.constant 0 : index
    %c0_4 = arith.constant 0 : index
    %2 = vector.load %arg1[%c0_3, %c0_4] : memref<32x128xf32, #tpu.memory_space<vmem>>, vector<32x128xf32>
    %cst = arith.constant dense<0.000000e+00> : vector<64x128xf32>
    %3 = tpu.matmul %1, %2, %cst {dimension_numbers = #tpu.dot_dimension_numbers<[1], [0], [0], [1], [0, 0, 1, 1], [], []>} : vector<64x32xf32>, vector<32x128xf32>, vector<64x128xf32> -> vector<64x128xf32>
    %c0_5 = arith.constant 0 : index
    %c0_6 = arith.constant 0 : index
    %4 = vector.load %arg3[%c0_5, %c0_6] : memref<1x128xf32, #tpu.memory_space<vmem>>, vector<1x128xf32>
    %5 = vector.broadcast %4 : vector<1x128xf32> to vector<64x128xf32>
    %6 = arith.addf %3, %5 : vector<64x128xf32>
    %c0_7 = arith.constant 0 : index
    %c0_8 = arith.constant 0 : index
    %7 = vector.load %arg9[%c0_7, %c0_8] : memref<64x128xf32, #tpu.memory_space<vmem>>, vector<64x128xf32>
    tpu.vector_store %arg9[%c0_7, %c0_8], %6 {strides = array<i32>} : memref<64x128xf32, #tpu.memory_space<vmem>>, vector<64x128xf32>,
    %cst_9 = arith.constant 0.000000e+00 : f32
    %8 = vector.broadcast %cst_9 : f32 to vector<8x32xf32>
    %cst_10 = arith.constant 0.000000e+00 : f32
    %9 = vector.broadcast %cst_10 : f32 to vector<8x32xf32>
    %c0_i32 = arith.constant 0 : i32
    %c8_i32 = arith.constant 8 : i32
    %10 = arith.muli %c0_i32, %c8_i32 : i32
    %11 = tpu.assume_multiple %10, 8 : i32
    %12 = arith.index_cast %11 : i32 to index
    %c0_11 = arith.constant 0 : index
    %13 = vector.load %arg9[%12, %c0_11] : memref<64x128xf32, #tpu.memory_space<vmem>>, vector<8x128xf32>
    %cst_12 = arith.constant dense<0.000000e+00> : vector<8x128xf32>
    %14 = tpu.matmul %8, %0, %cst_12 {dimension_numbers = #tpu.dot_dimension_numbers<[1], [0], [0], [1], [0, 0, 1, 1], [], []>} : vector<8x32xf32>, vector<32x128xf32>, vector<8x128xf32> -> vector<8x128xf32>
    %15 = arith.addf %13, %14 : vector<8x128xf32>
    %16 = vector.extract_strided_slice %15 {offsets = [0, 0], sizes = [8, 32], strides = [1, 1]} : vector<8x128xf32> to vector<8x32xf32>
    %17 = arith.negf %16 : vector<8x32xf32>
    %18 = math.exp %17 : vector<8x32xf32>
    %cst_13 = arith.constant 1.000000e+00 : f32
    %19 = vector.broadcast %cst_13 : f32 to vector<8x32xf32>
    %20 = arith.addf %19, %18 : vector<8x32xf32>
    %21 = arith.divf %19, %20 : vector<8x32xf32>
    %22 = vector.extract_strided_slice %15 {offsets = [0, 32], sizes = [8, 32], strides = [1, 1]} : vector<8x128xf32> to vector<8x32xf32>
    %23 = arith.negf %22 : vector<8x32xf32>
    %24 = math.exp %23 : vector<8x32xf32>
    %cst_14 = arith.constant 1.000000e+00 : f32
    %25 = vector.broadcast %cst_14 : f32 to vector<8x32xf32>
    %26 = arith.addf %25, %24 : vector<8x32xf32>
    %27 = arith.divf %25, %26 : vector<8x32xf32>
    %28 = vector.extract_strided_slice %15 {offsets = [0, 64], sizes = [8, 32], strides = [1, 1]} : vector<8x128xf32> to vector<8x32xf32>
    %29 = arith.negf %28 : vector<8x32xf32>
    %30 = math.exp %29 : vector<8x32xf32>
    %cst_15 = arith.constant 1.000000e+00 : f32
    %31 = vector.broadcast %cst_15 : f32 to vector<8x32xf32>
    %32 = arith.addf %31, %30 : vector<8x32xf32>
    %33 = arith.divf %31, %32 : vector<8x32xf32>
    %34 = vector.extract_strided_slice %15 {offsets = [0, 96], sizes = [8, 32], strides = [1, 1]} : vector<8x128xf32> to vector<8x32xf32>
    %35 = math.tanh %34 : vector<8x32xf32>
    %36 = arith.mulf %21, %35 : vector<8x32xf32>
    %37 = arith.mulf %27, %9 : vector<8x32xf32>
    %38 = arith.addf %36, %37 : vector<8x32xf32>
    %39 = math.tanh %38 : vector<8x32xf32>
    %40 = arith.mulf %33, %39 : vector<8x32xf32>
    %c1_i32 = arith.constant 1 : i32
    %c8_i32_16 = arith.constant 8 : i32
    %41 = arith.muli %c1_i32, %c8_i32_16 : i32
    %42 = tpu.assume_multiple %41, 8 : i32
    %43 = arith.index_cast %42 : i32 to index
    %c0_17 = arith.constant 0 : index
    %44 = vector.load %arg9[%43, %c0_17] : memref<64x128xf32, #tpu.memory_space<vmem>>, vector<8x128xf32>
    %cst_18 = arith.constant dense<0.000000e+00> : vector<8x128xf32>
    %45 = tpu.matmul %40, %0, %cst_18 {dimension_numbers = #tpu.dot_dimension_numbers<[1], [0], [0], [1], [0, 0, 1, 1], [], []>} : vector<8x32xf32>, vector<32x128xf32>, vector<8x128xf32> -> vector<8x128xf32>
    %46 = arith.addf %44, %45 : vector<8x128xf32>
    %47 = vector.extract_strided_slice %46 {offsets = [0, 0], sizes = [8, 32], strides = [1, 1]} : vector<8x128xf32> to vector<8x32xf32>
    %48 = arith.negf %47 : vector<8x32xf32>
    %49 = math.exp %48 : vector<8x32xf32>
    %cst_19 = arith.constant 1.000000e+00 : f32
    %50 = vector.broadcast %cst_19 : f32 to vector<8x32xf32>
    %51 = arith.addf %50, %49 : vector<8x32xf32>
    %52 = arith.divf %50, %51 : vector<8x32xf32>
    %53 = vector.extract_strided_slice %46 {offsets = [0, 32], sizes = [8, 32], strides = [1, 1]} : vector<8x128xf32> to vector<8x32xf32>
    %54 = arith.negf %53 : vector<8x32xf32>
    %55 = math.exp %54 : vector<8x32xf32>
    %cst_20 = arith.constant 1.000000e+00 : f32
    %56 = vector.broadcast %cst_20 : f32 to vector<8x32xf32>
    %57 = arith.addf %56, %55 : vector<8x32xf32>
    %58 = arith.divf %56, %57 : vector<8x32xf32>
    %59 = vector.extract_strided_slice %46 {offsets = [0, 64], sizes = [8, 32], strides = [1, 1]} : vector<8x128xf32> to vector<8x32xf32>
    %60 = arith.negf %59 : vector<8x32xf32>
    %61 = math.exp %60 : vector<8x32xf32>
    %cst_21 = arith.constant 1.000000e+00 : f32
    %62 = vector.broadcast %cst_21 : f32 to vector<8x32xf32>
    %63 = arith.addf %62, %61 : vector<8x32xf32>
    %64 = arith.divf %62, %63 : vector<8x32xf32>
    %65 = vector.extract_strided_slice %46 {offsets = [0, 96], sizes = [8, 32], strides = [1, 1]} : vector<8x128xf32> to vector<8x32xf32>
    %66 = math.tanh %65 : vector<8x32xf32>
    %67 = arith.mulf %52, %66 : vector<8x32xf32>
    %68 = arith.mulf %58, %38 : vector<8x32xf32>
    %69 = arith.addf %67, %68 : vector<8x32xf32>
    %70 = math.tanh %69 : vector<8x32xf32>
    %71 = arith.mulf %64, %70 : vector<8x32xf32>
    %c2_i32 = arith.constant 2 : i32
    %c8_i32_22 = arith.constant 8 : i32
    %72 = arith.muli %c2_i32, %c8_i32_22 : i32
    %73 = tpu.assume_multiple %72, 8 : i32
    %74 = arith.index_cast %73 : i32 to index
    %c0_23 = arith.constant 0 : index
    %75 = vector.load %arg9[%74, %c0_23] : memref<64x128xf32, #tpu.memory_space<vmem>>, vector<8x128xf32>
    %cst_24 = arith.constant dense<0.000000e+00> : vector<8x128xf32>
    %76 = tpu.matmul %71, %0, %cst_24 {dimension_numbers = #tpu.dot_dimension_numbers<[1], [0], [0], [1], [0, 0, 1, 1], [], []>} : vector<8x32xf32>, vector<32x128xf32>, vector<8x128xf32> -> vector<8x128xf32>
    %77 = arith.addf %75, %76 : vector<8x128xf32>
    %78 = vector.extract_strided_slice %77 {offsets = [0, 0], sizes = [8, 32], strides = [1, 1]} : vector<8x128xf32> to vector<8x32xf32>
    %79 = arith.negf %78 : vector<8x32xf32>
    %80 = math.exp %79 : vector<8x32xf32>
    %cst_25 = arith.constant 1.000000e+00 : f32
    %81 = vector.broadcast %cst_25 : f32 to vector<8x32xf32>
    %82 = arith.addf %81, %80 : vector<8x32xf32>
    %83 = arith.divf %81, %82 : vector<8x32xf32>
    %84 = vector.extract_strided_slice %77 {offsets = [0, 32], sizes = [8, 32], strides = [1, 1]} : vector<8x128xf32> to vector<8x32xf32>
    %85 = arith.negf %84 : vector<8x32xf32>
    %86 = math.exp %85 : vector<8x32xf32>
    %cst_26 = arith.constant 1.000000e+00 : f32
    %87 = vector.broadcast %cst_26 : f32 to vector<8x32xf32>
    %88 = arith.addf %87, %86 : vector<8x32xf32>
    %89 = arith.divf %87, %88 : vector<8x32xf32>
    %90 = vector.extract_strided_slice %77 {offsets = [0, 64], sizes = [8, 32], strides = [1, 1]} : vector<8x128xf32> to vector<8x32xf32>
    %91 = arith.negf %90 : vector<8x32xf32>
    %92 = math.exp %91 : vector<8x32xf32>
    %cst_27 = arith.constant 1.000000e+00 : f32
    %93 = vector.broadcast %cst_27 : f32 to vector<8x32xf32>
    %94 = arith.addf %93, %92 : vector<8x32xf32>
    %95 = arith.divf %93, %94 : vector<8x32xf32>
    %96 = vector.extract_strided_slice %77 {offsets = [0, 96], sizes = [8, 32], strides = [1, 1]} : vector<8x128xf32> to vector<8x32xf32>
    %97 = math.tanh %96 : vector<8x32xf32>
    %98 = arith.mulf %83, %97 : vector<8x32xf32>
    %99 = arith.mulf %89, %69 : vector<8x32xf32>
    %100 = arith.addf %98, %99 : vector<8x32xf32>
    %101 = math.tanh %100 : vector<8x32xf32>
    %102 = arith.mulf %95, %101 : vector<8x32xf32>
    %c3_i32 = arith.constant 3 : i32
    %c8_i32_28 = arith.constant 8 : i32
    %103 = arith.muli %c3_i32, %c8_i32_28 : i32
    %104 = tpu.assume_multiple %103, 8 : i32
    %105 = arith.index_cast %104 : i32 to index
    %c0_29 = arith.constant 0 : index
    %106 = vector.load %arg9[%105, %c0_29] : memref<64x128xf32, #tpu.memory_space<vmem>>, vector<8x128xf32>
    %cst_30 = arith.constant dense<0.000000e+00> : vector<8x128xf32>
    %107 = tpu.matmul %102, %0, %cst_30 {dimension_numbers = #tpu.dot_dimension_numbers<[1], [0], [0], [1], [0, 0, 1, 1], [], []>} : vector<8x32xf32>, vector<32x128xf32>, vector<8x128xf32> -> vector<8x128xf32>
    %108 = arith.addf %106, %107 : vector<8x128xf32>
    %109 = vector.extract_strided_slice %108 {offsets = [0, 0], sizes = [8, 32], strides = [1, 1]} : vector<8x128xf32> to vector<8x32xf32>
    %110 = arith.negf %109 : vector<8x32xf32>
    %111 = math.exp %110 : vector<8x32xf32>
    %cst_31 = arith.constant 1.000000e+00 : f32
    %112 = vector.broadcast %cst_31 : f32 to vector<8x32xf32>
    %113 = arith.addf %112, %111 : vector<8x32xf32>
    %114 = arith.divf %112, %113 : vector<8x32xf32>
    %115 = vector.extract_strided_slice %108 {offsets = [0, 32], sizes = [8, 32], strides = [1, 1]} : vector<8x128xf32> to vector<8x32xf32>
    %116 = arith.negf %115 : vector<8x32xf32>
    %117 = math.exp %116 : vector<8x32xf32>
    %cst_32 = arith.constant 1.000000e+00 : f32
    %118 = vector.broadcast %cst_32 : f32 to vector<8x32xf32>
    %119 = arith.addf %118, %117 : vector<8x32xf32>
    %120 = arith.divf %118, %119 : vector<8x32xf32>
    %121 = vector.extract_strided_slice %108 {offsets = [0, 64], sizes = [8, 32], strides = [1, 1]} : vector<8x128xf32> to vector<8x32xf32>
    %122 = arith.negf %121 : vector<8x32xf32>
    %123 = math.exp %122 : vector<8x32xf32>
    %cst_33 = arith.constant 1.000000e+00 : f32
    %124 = vector.broadcast %cst_33 : f32 to vector<8x32xf32>
    %125 = arith.addf %124, %123 : vector<8x32xf32>
    %126 = arith.divf %124, %125 : vector<8x32xf32>
    %127 = vector.extract_strided_slice %108 {offsets = [0, 96], sizes = [8, 32], strides = [1, 1]} : vector<8x128xf32> to vector<8x32xf32>
    %128 = math.tanh %127 : vector<8x32xf32>
    %129 = arith.mulf %114, %128 : vector<8x32xf32>
    %130 = arith.mulf %120, %100 : vector<8x32xf32>
    %131 = arith.addf %129, %130 : vector<8x32xf32>
    %132 = math.tanh %131 : vector<8x32xf32>
    %133 = arith.mulf %126, %132 : vector<8x32xf32>
    %c4_i32 = arith.constant 4 : i32
    %c8_i32_34 = arith.constant 8 : i32
    %134 = arith.muli %c4_i32, %c8_i32_34 : i32
    %135 = tpu.assume_multiple %134, 8 : i32
    %136 = arith.index_cast %135 : i32 to index
    %c0_35 = arith.constant 0 : index
    %137 = vector.load %arg9[%136, %c0_35] : memref<64x128xf32, #tpu.memory_space<vmem>>, vector<8x128xf32>
    %cst_36 = arith.constant dense<0.000000e+00> : vector<8x128xf32>
    %138 = tpu.matmul %133, %0, %cst_36 {dimension_numbers = #tpu.dot_dimension_numbers<[1], [0], [0], [1], [0, 0, 1, 1], [], []>} : vector<8x32xf32>, vector<32x128xf32>, vector<8x128xf32> -> vector<8x128xf32>
    %139 = arith.addf %137, %138 : vector<8x128xf32>
    %140 = vector.extract_strided_slice %139 {offsets = [0, 0], sizes = [8, 32], strides = [1, 1]} : vector<8x128xf32> to vector<8x32xf32>
    %141 = arith.negf %140 : vector<8x32xf32>
    %142 = math.exp %141 : vector<8x32xf32>
    %cst_37 = arith.constant 1.000000e+00 : f32
    %143 = vector.broadcast %cst_37 : f32 to vector<8x32xf32>
    %144 = arith.addf %143, %142 : vector<8x32xf32>
    %145 = arith.divf %143, %144 : vector<8x32xf32>
    %146 = vector.extract_strided_slice %139 {offsets = [0, 32], sizes = [8, 32], strides = [1, 1]} : vector<8x128xf32> to vector<8x32xf32>
    %147 = arith.negf %146 : vector<8x32xf32>
    %148 = math.exp %147 : vector<8x32xf32>
    %cst_38 = arith.constant 1.000000e+00 : f32
    %149 = vector.broadcast %cst_38 : f32 to vector<8x32xf32>
    %150 = arith.addf %149, %148 : vector<8x32xf32>
    %151 = arith.divf %149, %150 : vector<8x32xf32>
    %152 = vector.extract_strided_slice %139 {offsets = [0, 64], sizes = [8, 32], strides = [1, 1]} : vector<8x128xf32> to vector<8x32xf32>
    %153 = arith.negf %152 : vector<8x32xf32>
    %154 = math.exp %153 : vector<8x32xf32>
    %cst_39 = arith.constant 1.000000e+00 : f32
    %155 = vector.broadcast %cst_39 : f32 to vector<8x32xf32>
    %156 = arith.addf %155, %154 : vector<8x32xf32>
    %157 = arith.divf %155, %156 : vector<8x32xf32>
    %158 = vector.extract_strided_slice %139 {offsets = [0, 96], sizes = [8, 32], strides = [1, 1]} : vector<8x128xf32> to vector<8x32xf32>
    %159 = math.tanh %158 : vector<8x32xf32>
    %160 = arith.mulf %145, %159 : vector<8x32xf32>
    %161 = arith.mulf %151, %131 : vector<8x32xf32>
    %162 = arith.addf %160, %161 : vector<8x32xf32>
    %163 = math.tanh %162 : vector<8x32xf32>
    %164 = arith.mulf %157, %163 : vector<8x32xf32>
    %c5_i32 = arith.constant 5 : i32
    %c8_i32_40 = arith.constant 8 : i32
    %165 = arith.muli %c5_i32, %c8_i32_40 : i32
    %166 = tpu.assume_multiple %165, 8 : i32
    %167 = arith.index_cast %166 : i32 to index
    %c0_41 = arith.constant 0 : index
    %168 = vector.load %arg9[%167, %c0_41] : memref<64x128xf32, #tpu.memory_space<vmem>>, vector<8x128xf32>
    %cst_42 = arith.constant dense<0.000000e+00> : vector<8x128xf32>
    %169 = tpu.matmul %164, %0, %cst_42 {dimension_numbers = #tpu.dot_dimension_numbers<[1], [0], [0], [1], [0, 0, 1, 1], [], []>} : vector<8x32xf32>, vector<32x128xf32>, vector<8x128xf32> -> vector<8x128xf32>
    %170 = arith.addf %168, %169 : vector<8x128xf32>
    %171 = vector.extract_strided_slice %170 {offsets = [0, 0], sizes = [8, 32], strides = [1, 1]} : vector<8x128xf32> to vector<8x32xf32>
    %172 = arith.negf %171 : vector<8x32xf32>
    %173 = math.exp %172 : vector<8x32xf32>
    %cst_43 = arith.constant 1.000000e+00 : f32
    %174 = vector.broadcast %cst_43 : f32 to vector<8x32xf32>
    %175 = arith.addf %174, %173 : vector<8x32xf32>
    %176 = arith.divf %174, %175 : vector<8x32xf32>
    %177 = vector.extract_strided_slice %170 {offsets = [0, 32], sizes = [8, 32], strides = [1, 1]} : vector<8x128xf32> to vector<8x32xf32>
    %178 = arith.negf %177 : vector<8x32xf32>
    %179 = math.exp %178 : vector<8x32xf32>
    %cst_44 = arith.constant 1.000000e+00 : f32
    %180 = vector.broadcast %cst_44 : f32 to vector<8x32xf32>
    %181 = arith.addf %180, %179 : vector<8x32xf32>
    %182 = arith.divf %180, %181 : vector<8x32xf32>
    %183 = vector.extract_strided_slice %170 {offsets = [0, 64], sizes = [8, 32], strides = [1, 1]} : vector<8x128xf32> to vector<8x32xf32>
    %184 = arith.negf %183 : vector<8x32xf32>
    %185 = math.exp %184 : vector<8x32xf32>
    %cst_45 = arith.constant 1.000000e+00 : f32
    %186 = vector.broadcast %cst_45 : f32 to vector<8x32xf32>
    %187 = arith.addf %186, %185 : vector<8x32xf32>
    %188 = arith.divf %186, %187 : vector<8x32xf32>
    %189 = vector.extract_strided_slice %170 {offsets = [0, 96], sizes = [8, 32], strides = [1, 1]} : vector<8x128xf32> to vector<8x32xf32>
    %190 = math.tanh %189 : vector<8x32xf32>
    %191 = arith.mulf %176, %190 : vector<8x32xf32>
    %192 = arith.mulf %182, %162 : vector<8x32xf32>
    %193 = arith.addf %191, %192 : vector<8x32xf32>
    %194 = math.tanh %193 : vector<8x32xf32>
    %195 = arith.mulf %188, %194 : vector<8x32xf32>
    %c6_i32 = arith.constant 6 : i32
    %c8_i32_46 = arith.constant 8 : i32
    %196 = arith.muli %c6_i32, %c8_i32_46 : i32
    %197 = tpu.assume_multiple %196, 8 : i32
    %198 = arith.index_cast %197 : i32 to index
    %c0_47 = arith.constant 0 : index
    %199 = vector.load %arg9[%198, %c0_47] : memref<64x128xf32, #tpu.memory_space<vmem>>, vector<8x128xf32>
    %cst_48 = arith.constant dense<0.000000e+00> : vector<8x128xf32>
    %200 = tpu.matmul %195, %0, %cst_48 {dimension_numbers = #tpu.dot_dimension_numbers<[1], [0], [0], [1], [0, 0, 1, 1], [], []>} : vector<8x32xf32>, vector<32x128xf32>, vector<8x128xf32> -> vector<8x128xf32>
    %201 = arith.addf %199, %200 : vector<8x128xf32>
    %202 = vector.extract_strided_slice %201 {offsets = [0, 0], sizes = [8, 32], strides = [1, 1]} : vector<8x128xf32> to vector<8x32xf32>
    %203 = arith.negf %202 : vector<8x32xf32>
    %204 = math.exp %203 : vector<8x32xf32>
    %cst_49 = arith.constant 1.000000e+00 : f32
    %205 = vector.broadcast %cst_49 : f32 to vector<8x32xf32>
    %206 = arith.addf %205, %204 : vector<8x32xf32>
    %207 = arith.divf %205, %206 : vector<8x32xf32>
    %208 = vector.extract_strided_slice %201 {offsets = [0, 32], sizes = [8, 32], strides = [1, 1]} : vector<8x128xf32> to vector<8x32xf32>
    %209 = arith.negf %208 : vector<8x32xf32>
    %210 = math.exp %209 : vector<8x32xf32>
    %cst_50 = arith.constant 1.000000e+00 : f32
    %211 = vector.broadcast %cst_50 : f32 to vector<8x32xf32>
    %212 = arith.addf %211, %210 : vector<8x32xf32>
    %213 = arith.divf %211, %212 : vector<8x32xf32>
    %214 = vector.extract_strided_slice %201 {offsets = [0, 64], sizes = [8, 32], strides = [1, 1]} : vector<8x128xf32> to vector<8x32xf32>
    %215 = arith.negf %214 : vector<8x32xf32>
    %216 = math.exp %215 : vector<8x32xf32>
    %cst_51 = arith.constant 1.000000e+00 : f32
    %217 = vector.broadcast %cst_51 : f32 to vector<8x32xf32>
    %218 = arith.addf %217, %216 : vector<8x32xf32>
    %219 = arith.divf %217, %218 : vector<8x32xf32>
    %220 = vector.extract_strided_slice %201 {offsets = [0, 96], sizes = [8, 32], strides = [1, 1]} : vector<8x128xf32> to vector<8x32xf32>
    %221 = math.tanh %220 : vector<8x32xf32>
    %222 = arith.mulf %207, %221 : vector<8x32xf32>
    %223 = arith.mulf %213, %193 : vector<8x32xf32>
    %224 = arith.addf %222, %223 : vector<8x32xf32>
    %225 = math.tanh %224 : vector<8x32xf32>
    %226 = arith.mulf %219, %225 : vector<8x32xf32>
    %c7_i32 = arith.constant 7 : i32
    %c8_i32_52 = arith.constant 8 : i32
    %227 = arith.muli %c7_i32, %c8_i32_52 : i32
    %228 = tpu.assume_multiple %227, 8 : i32
    %229 = arith.index_cast %228 : i32 to index
    %c0_53 = arith.constant 0 : index
    %230 = vector.load %arg9[%229, %c0_53] : memref<64x128xf32, #tpu.memory_space<vmem>>, vector<8x128xf32>
    %cst_54 = arith.constant dense<0.000000e+00> : vector<8x128xf32>
    %231 = tpu.matmul %226, %0, %cst_54 {dimension_numbers = #tpu.dot_dimension_numbers<[1], [0], [0], [1], [0, 0, 1, 1], [], []>} : vector<8x32xf32>, vector<32x128xf32>, vector<8x128xf32> -> vector<8x128xf32>
    %232 = arith.addf %230, %231 : vector<8x128xf32>
    %233 = vector.extract_strided_slice %232 {offsets = [0, 0], sizes = [8, 32], strides = [1, 1]} : vector<8x128xf32> to vector<8x32xf32>
    %234 = arith.negf %233 : vector<8x32xf32>
    %235 = math.exp %234 : vector<8x32xf32>
    %cst_55 = arith.constant 1.000000e+00 : f32
    %236 = vector.broadcast %cst_55 : f32 to vector<8x32xf32>
    %237 = arith.addf %236, %235 : vector<8x32xf32>
    %238 = arith.divf %236, %237 : vector<8x32xf32>
    %239 = vector.extract_strided_slice %232 {offsets = [0, 32], sizes = [8, 32], strides = [1, 1]} : vector<8x128xf32> to vector<8x32xf32>
    %240 = arith.negf %239 : vector<8x32xf32>
    %241 = math.exp %240 : vector<8x32xf32>
    %cst_56 = arith.constant 1.000000e+00 : f32
    %242 = vector.broadcast %cst_56 : f32 to vector<8x32xf32>
    %243 = arith.addf %242, %241 : vector<8x32xf32>
    %244 = arith.divf %242, %243 : vector<8x32xf32>
    %245 = vector.extract_strided_slice %232 {offsets = [0, 64], sizes = [8, 32], strides = [1, 1]} : vector<8x128xf32> to vector<8x32xf32>
    %246 = arith.negf %245 : vector<8x32xf32>
    %247 = math.exp %246 : vector<8x32xf32>
    %cst_57 = arith.constant 1.000000e+00 : f32
    %248 = vector.broadcast %cst_57 : f32 to vector<8x32xf32>
    %249 = arith.addf %248, %247 : vector<8x32xf32>
    %250 = arith.divf %248, %249 : vector<8x32xf32>
    %251 = vector.extract_strided_slice %232 {offsets = [0, 96], sizes = [8, 32], strides = [1, 1]} : vector<8x128xf32> to vector<8x32xf32>
    %252 = math.tanh %251 : vector<8x32xf32>
    %253 = arith.mulf %238, %252 : vector<8x32xf32>
    %254 = arith.mulf %244, %224 : vector<8x32xf32>
    %255 = arith.addf %253, %254 : vector<8x32xf32>
    %256 = math.tanh %255 : vector<8x32xf32>
    %257 = arith.mulf %250, %256 : vector<8x32xf32>
    %c8_i32_58 = arith.constant 8 : i32
    %c0_59 = arith.constant 0 : index
    %c0_60 = arith.constant 0 : index
    %258 = vector.load %arg6[%c0_59, %c0_60] : memref<32x256xf32, #tpu.memory_space<vmem>>, vector<32x256xf32>
    %c0_61 = arith.constant 0 : index
    %c0_62 = arith.constant 0 : index
    %259 = vector.load %arg7[%c0_61, %c0_62] : memref<1x256xf32, #tpu.memory_space<vmem>>, vector<1x256xf32>
    %260 = vector.shape_cast %259 : vector<1x256xf32> to vector<1x256xf32>
    %261 = vector.broadcast %260 : vector<1x256xf32> to vector<8x256xf32>
    %c0_63 = arith.constant 0 : index
    %c0_64 = arith.constant 0 : index
    %262 = vector.load %arg4[%c0_63, %c0_64] : memref<32x128xf32, #tpu.memory_space<vmem>>, vector<32x128xf32>
    %cst_65 = arith.constant dense<0.000000e+00> : vector<8x128xf32>
    %263 = tpu.matmul %257, %262, %cst_65 {dimension_numbers = #tpu.dot_dimension_numbers<[1], [0], [0], [1], [0, 0, 1, 1], [], []>} : vector<8x32xf32>, vector<32x128xf32>, vector<8x128xf32> -> vector<8x128xf32>
    %c0_66 = arith.constant 0 : index
    %c0_67 = arith.constant 0 : index
    %264 = vector.load %arg5[%c0_66, %c0_67] : memref<1x128xf32, #tpu.memory_space<vmem>>, vector<1x128xf32>
    %265 = vector.broadcast %264 : vector<1x128xf32> to vector<8x128xf32>
    %266 = arith.addf %263, %265 : vector<8x128xf32>
    %c0_i32_68 = arith.constant 0 : i32
    %267 = vector.extract_strided_slice %266 {offsets = [0, 0], sizes = [8, 32], strides = [1, 1]} : vector<8x128xf32> to vector<8x32xf32>
    %268 = arith.negf %267 : vector<8x32xf32>
    %269 = math.exp %268 : vector<8x32xf32>
    %cst_69 = arith.constant 1.000000e+00 : f32
    %270 = vector.broadcast %cst_69 : f32 to vector<8x32xf32>
    %271 = arith.addf %270, %269 : vector<8x32xf32>
    %272 = arith.divf %270, %271 : vector<8x32xf32>
    %273 = vector.extract_strided_slice %266 {offsets = [0, 32], sizes = [8, 32], strides = [1, 1]} : vector<8x128xf32> to vector<8x32xf32>
    %274 = arith.negf %273 : vector<8x32xf32>
    %275 = math.exp %274 : vector<8x32xf32>
    %cst_70 = arith.constant 1.000000e+00 : f32
    %276 = vector.broadcast %cst_70 : f32 to vector<8x32xf32>
    %277 = arith.addf %276, %275 : vector<8x32xf32>
    %278 = arith.divf %276, %277 : vector<8x32xf32>
    %279 = vector.extract_strided_slice %266 {offsets = [0, 64], sizes = [8, 32], strides = [1, 1]} : vector<8x128xf32> to vector<8x32xf32>
    %280 = math.tanh %279 : vector<8x32xf32>
    %281 = vector.extract_strided_slice %266 {offsets = [0, 96], sizes = [8, 32], strides = [1, 1]} : vector<8x128xf32> to vector<8x32xf32>
    %282 = arith.negf %281 : vector<8x32xf32>
    %283 = math.exp %282 : vector<8x32xf32>
    %cst_71 = arith.constant 1.000000e+00 : f32
    %284 = vector.broadcast %cst_71 : f32 to vector<8x32xf32>
    %285 = arith.addf %284, %283 : vector<8x32xf32>
    %286 = arith.divf %284, %285 : vector<8x32xf32>
    %287 = arith.mulf %278, %9 : vector<8x32xf32>
    %288 = arith.mulf %272, %280 : vector<8x32xf32>
    %289 = arith.addf %287, %288 : vector<8x32xf32>
    %290 = math.tanh %289 : vector<8x32xf32>
    %291 = arith.mulf %286, %290 : vector<8x32xf32>
    %cst_72 = arith.constant dense<0.000000e+00> : vector<8x256xf32>
    %292 = tpu.matmul %291, %258, %cst_72 {dimension_numbers = #tpu.dot_dimension_numbers<[1], [0], [0], [1], [0, 0, 1, 1], [], []>} : vector<8x32xf32>, vector<32x256xf32>, vector<8x256xf32> -> vector<8x256xf32>
    %293 = arith.addf %292, %261 : vector<8x256xf32>
    %294 = vector.extract_strided_slice %293 {offsets = [0, 128], sizes = [8, 128], strides = [1, 1]} : vector<8x256xf32> to vector<8x128xf32>
    %295 = arith.index_cast %c0_i32_68 : i32 to index
    %c0_73 = arith.constant 0 : index
    %c0_74 = arith.constant 0 : index
    %296 = vector.load %arg8[%295, %c0_73, %c0_74] : memref<6x8x128xf32, #tpu.memory_space<vmem>>, vector<1x8x128xf32>
    %297 = vector.shape_cast %296 : vector<1x8x128xf32> to vector<8x128xf32>
    %298 = vector.shape_cast %294 : vector<8x128xf32> to vector<1x8x128xf32>
    tpu.vector_store %arg8[%295, %c0_73, %c0_74], %298 {strides = array<i32>} : memref<6x8x128xf32, #tpu.memory_space<vmem>>, vector<1x8x128xf32>,
    %299 = vector.extract_strided_slice %293 {offsets = [0, 0], sizes = [8, 128], strides = [1, 1]} : vector<8x256xf32> to vector<8x128xf32>
    %c1_i32_75 = arith.constant 1 : i32
    %300 = vector.extract_strided_slice %299 {offsets = [0, 0], sizes = [8, 32], strides = [1, 1]} : vector<8x128xf32> to vector<8x32xf32>
    %301 = arith.negf %300 : vector<8x32xf32>
    %302 = math.exp %301 : vector<8x32xf32>
    %cst_76 = arith.constant 1.000000e+00 : f32
    %303 = vector.broadcast %cst_76 : f32 to vector<8x32xf32>
    %304 = arith.addf %303, %302 : vector<8x32xf32>
    %305 = arith.divf %303, %304 : vector<8x32xf32>
    %306 = vector.extract_strided_slice %299 {offsets = [0, 32], sizes = [8, 32], strides = [1, 1]} : vector<8x128xf32> to vector<8x32xf32>
    %307 = arith.negf %306 : vector<8x32xf32>
    %308 = math.exp %307 : vector<8x32xf32>
    %cst_77 = arith.constant 1.000000e+00 : f32
    %309 = vector.broadcast %cst_77 : f32 to vector<8x32xf32>
    %310 = arith.addf %309, %308 : vector<8x32xf32>
    %311 = arith.divf %309, %310 : vector<8x32xf32>
    %312 = vector.extract_strided_slice %299 {offsets = [0, 64], sizes = [8, 32], strides = [1, 1]} : vector<8x128xf32> to vector<8x32xf32>
    %313 = math.tanh %312 : vector<8x32xf32>
    %314 = vector.extract_strided_slice %299 {offsets = [0, 96], sizes = [8, 32], strides = [1, 1]} : vector<8x128xf32> to vector<8x32xf32>
    %315 = arith.negf %314 : vector<8x32xf32>
    %316 = math.exp %315 : vector<8x32xf32>
    %cst_78 = arith.constant 1.000000e+00 : f32
    %317 = vector.broadcast %cst_78 : f32 to vector<8x32xf32>
    %318 = arith.addf %317, %316 : vector<8x32xf32>
    %319 = arith.divf %317, %318 : vector<8x32xf32>
    %320 = arith.mulf %311, %289 : vector<8x32xf32>
    %321 = arith.mulf %305, %313 : vector<8x32xf32>
    %322 = arith.addf %320, %321 : vector<8x32xf32>
    %323 = math.tanh %322 : vector<8x32xf32>
    %324 = arith.mulf %319, %323 : vector<8x32xf32>
    %cst_79 = arith.constant dense<0.000000e+00> : vector<8x256xf32>
    %325 = tpu.matmul %324, %258, %cst_79 {dimension_numbers = #tpu.dot_dimension_numbers<[1], [0], [0], [1], [0, 0, 1, 1], [], []>} : vector<8x32xf32>, vector<32x256xf32>, vector<8x256xf32> -> vector<8x256xf32>
    %326 = arith.addf %325, %261 : vector<8x256xf32>
    %327 = vector.extract_strided_slice %326 {offsets = [0, 128], sizes = [8, 128], strides = [1, 1]} : vector<8x256xf32> to vector<8x128xf32>
    %328 = arith.index_cast %c1_i32_75 : i32 to index
    %c0_80 = arith.constant 0 : index
    %c0_81 = arith.constant 0 : index
    %329 = vector.load %arg8[%328, %c0_80, %c0_81] : memref<6x8x128xf32, #tpu.memory_space<vmem>>, vector<1x8x128xf32>
    %330 = vector.shape_cast %329 : vector<1x8x128xf32> to vector<8x128xf32>
    %331 = vector.shape_cast %327 : vector<8x128xf32> to vector<1x8x128xf32>
    tpu.vector_store %arg8[%328, %c0_80, %c0_81], %331 {strides = array<i32>} : memref<6x8x128xf32, #tpu.memory_space<vmem>>, vector<1x8x128xf32>,
    %332 = vector.extract_strided_slice %326 {offsets = [0, 0], sizes = [8, 128], strides = [1, 1]} : vector<8x256xf32> to vector<8x128xf32>
    %c2_i32_82 = arith.constant 2 : i32
    %333 = vector.extract_strided_slice %332 {offsets = [0, 0], sizes = [8, 32], strides = [1, 1]} : vector<8x128xf32> to vector<8x32xf32>
    %334 = arith.negf %333 : vector<8x32xf32>
    %335 = math.exp %334 : vector<8x32xf32>
    %cst_83 = arith.constant 1.000000e+00 : f32
    %336 = vector.broadcast %cst_83 : f32 to vector<8x32xf32>
    %337 = arith.addf %336, %335 : vector<8x32xf32>
    %338 = arith.divf %336, %337 : vector<8x32xf32>
    %339 = vector.extract_strided_slice %332 {offsets = [0, 32], sizes = [8, 32], strides = [1, 1]} : vector<8x128xf32> to vector<8x32xf32>
    %340 = arith.negf %339 : vector<8x32xf32>
    %341 = math.exp %340 : vector<8x32xf32>
    %cst_84 = arith.constant 1.000000e+00 : f32
    %342 = vector.broadcast %cst_84 : f32 to vector<8x32xf32>
    %343 = arith.addf %342, %341 : vector<8x32xf32>
    %344 = arith.divf %342, %343 : vector<8x32xf32>
    %345 = vector.extract_strided_slice %332 {offsets = [0, 64], sizes = [8, 32], strides = [1, 1]} : vector<8x128xf32> to vector<8x32xf32>
    %346 = math.tanh %345 : vector<8x32xf32>
    %347 = vector.extract_strided_slice %332 {offsets = [0, 96], sizes = [8, 32], strides = [1, 1]} : vector<8x128xf32> to vector<8x32xf32>
    %348 = arith.negf %347 : vector<8x32xf32>
    %349 = math.exp %348 : vector<8x32xf32>
    %cst_85 = arith.constant 1.000000e+00 : f32
    %350 = vector.broadcast %cst_85 : f32 to vector<8x32xf32>
    %351 = arith.addf %350, %349 : vector<8x32xf32>
    %352 = arith.divf %350, %351 : vector<8x32xf32>
    %353 = arith.mulf %344, %322 : vector<8x32xf32>
    %354 = arith.mulf %338, %346 : vector<8x32xf32>
    %355 = arith.addf %353, %354 : vector<8x32xf32>
    %356 = math.tanh %355 : vector<8x32xf32>
    %357 = arith.mulf %352, %356 : vector<8x32xf32>
    %cst_86 = arith.constant dense<0.000000e+00> : vector<8x256xf32>
    %358 = tpu.matmul %357, %258, %cst_86 {dimension_numbers = #tpu.dot_dimension_numbers<[1], [0], [0], [1], [0, 0, 1, 1], [], []>} : vector<8x32xf32>, vector<32x256xf32>, vector<8x256xf32> -> vector<8x256xf32>
    %359 = arith.addf %358, %261 : vector<8x256xf32>
    %360 = vector.extract_strided_slice %359 {offsets = [0, 128], sizes = [8, 128], strides = [1, 1]} : vector<8x256xf32> to vector<8x128xf32>
    %361 = arith.index_cast %c2_i32_82 : i32 to index
    %c0_87 = arith.constant 0 : index
    %c0_88 = arith.constant 0 : index
    %362 = vector.load %arg8[%361, %c0_87, %c0_88] : memref<6x8x128xf32, #tpu.memory_space<vmem>>, vector<1x8x128xf32>
    %363 = vector.shape_cast %362 : vector<1x8x128xf32> to vector<8x128xf32>
    %364 = vector.shape_cast %360 : vector<8x128xf32> to vector<1x8x128xf32>
    tpu.vector_store %arg8[%361, %c0_87, %c0_88], %364 {strides = array<i32>} : memref<6x8x128xf32, #tpu.memory_space<vmem>>, vector<1x8x128xf32>,
    %365 = vector.extract_strided_slice %359 {offsets = [0, 0], sizes = [8, 128], strides = [1, 1]} : vector<8x256xf32> to vector<8x128xf32>
    %c3_i32_89 = arith.constant 3 : i32
    %366 = vector.extract_strided_slice %365 {offsets = [0, 0], sizes = [8, 32], strides = [1, 1]} : vector<8x128xf32> to vector<8x32xf32>
    %367 = arith.negf %366 : vector<8x32xf32>
    %368 = math.exp %367 : vector<8x32xf32>
    %cst_90 = arith.constant 1.000000e+00 : f32
    %369 = vector.broadcast %cst_90 : f32 to vector<8x32xf32>
    %370 = arith.addf %369, %368 : vector<8x32xf32>
    %371 = arith.divf %369, %370 : vector<8x32xf32>
    %372 = vector.extract_strided_slice %365 {offsets = [0, 32], sizes = [8, 32], strides = [1, 1]} : vector<8x128xf32> to vector<8x32xf32>
    %373 = arith.negf %372 : vector<8x32xf32>
    %374 = math.exp %373 : vector<8x32xf32>
    %cst_91 = arith.constant 1.000000e+00 : f32
    %375 = vector.broadcast %cst_91 : f32 to vector<8x32xf32>
    %376 = arith.addf %375, %374 : vector<8x32xf32>
    %377 = arith.divf %375, %376 : vector<8x32xf32>
    %378 = vector.extract_strided_slice %365 {offsets = [0, 64], sizes = [8, 32], strides = [1, 1]} : vector<8x128xf32> to vector<8x32xf32>
    %379 = math.tanh %378 : vector<8x32xf32>
    %380 = vector.extract_strided_slice %365 {offsets = [0, 96], sizes = [8, 32], strides = [1, 1]} : vector<8x128xf32> to vector<8x32xf32>
    %381 = arith.negf %380 : vector<8x32xf32>
    %382 = math.exp %381 : vector<8x32xf32>
    %cst_92 = arith.constant 1.000000e+00 : f32
    %383 = vector.broadcast %cst_92 : f32 to vector<8x32xf32>
    %384 = arith.addf %383, %382 : vector<8x32xf32>
    %385 = arith.divf %383, %384 : vector<8x32xf32>
    %386 = arith.mulf %377, %355 : vector<8x32xf32>
    %387 = arith.mulf %371, %379 : vector<8x32xf32>
    %388 = arith.addf %386, %387 : vector<8x32xf32>
    %389 = math.tanh %388 : vector<8x32xf32>
    %390 = arith.mulf %385, %389 : vector<8x32xf32>
    %cst_93 = arith.constant dense<0.000000e+00> : vector<8x256xf32>
    %391 = tpu.matmul %390, %258, %cst_93 {dimension_numbers = #tpu.dot_dimension_numbers<[1], [0], [0], [1], [0, 0, 1, 1], [], []>} : vector<8x32xf32>, vector<32x256xf32>, vector<8x256xf32> -> vector<8x256xf32>
    %392 = arith.addf %391, %261 : vector<8x256xf32>
    %393 = vector.extract_strided_slice %392 {offsets = [0, 128], sizes = [8, 128], strides = [1, 1]} : vector<8x256xf32> to vector<8x128xf32>
    %394 = arith.index_cast %c3_i32_89 : i32 to index
    %c0_94 = arith.constant 0 : index
    %c0_95 = arith.constant 0 : index
    %395 = vector.load %arg8[%394, %c0_94, %c0_95] : memref<6x8x128xf32, #tpu.memory_space<vmem>>, vector<1x8x128xf32>
    %396 = vector.shape_cast %395 : vector<1x8x128xf32> to vector<8x128xf32>
    %397 = vector.shape_cast %393 : vector<8x128xf32> to vector<1x8x128xf32>
    tpu.vector_store %arg8[%394, %c0_94, %c0_95], %397 {strides = array<i32>} : memref<6x8x128xf32, #tpu.memory_space<vmem>>, vector<1x8x128xf32>,
    %398 = vector.extract_strided_slice %392 {offsets = [0, 0], sizes = [8, 128], strides = [1, 1]} : vector<8x256xf32> to vector<8x128xf32>
    %c4_i32_96 = arith.constant 4 : i32
    %399 = vector.extract_strided_slice %398 {offsets = [0, 0], sizes = [8, 32], strides = [1, 1]} : vector<8x128xf32> to vector<8x32xf32>
    %400 = arith.negf %399 : vector<8x32xf32>
    %401 = math.exp %400 : vector<8x32xf32>
    %cst_97 = arith.constant 1.000000e+00 : f32
    %402 = vector.broadcast %cst_97 : f32 to vector<8x32xf32>
    %403 = arith.addf %402, %401 : vector<8x32xf32>
    %404 = arith.divf %402, %403 : vector<8x32xf32>
    %405 = vector.extract_strided_slice %398 {offsets = [0, 32], sizes = [8, 32], strides = [1, 1]} : vector<8x128xf32> to vector<8x32xf32>
    %406 = arith.negf %405 : vector<8x32xf32>
    %407 = math.exp %406 : vector<8x32xf32>
    %cst_98 = arith.constant 1.000000e+00 : f32
    %408 = vector.broadcast %cst_98 : f32 to vector<8x32xf32>
    %409 = arith.addf %408, %407 : vector<8x32xf32>
    %410 = arith.divf %408, %409 : vector<8x32xf32>
    %411 = vector.extract_strided_slice %398 {offsets = [0, 64], sizes = [8, 32], strides = [1, 1]} : vector<8x128xf32> to vector<8x32xf32>
    %412 = math.tanh %411 : vector<8x32xf32>
    %413 = vector.extract_strided_slice %398 {offsets = [0, 96], sizes = [8, 32], strides = [1, 1]} : vector<8x128xf32> to vector<8x32xf32>
    %414 = arith.negf %413 : vector<8x32xf32>
    %415 = math.exp %414 : vector<8x32xf32>
    %cst_99 = arith.constant 1.000000e+00 : f32
    %416 = vector.broadcast %cst_99 : f32 to vector<8x32xf32>
    %417 = arith.addf %416, %415 : vector<8x32xf32>
    %418 = arith.divf %416, %417 : vector<8x32xf32>
    %419 = arith.mulf %410, %388 : vector<8x32xf32>
    %420 = arith.mulf %404, %412 : vector<8x32xf32>
    %421 = arith.addf %419, %420 : vector<8x32xf32>
    %422 = math.tanh %421 : vector<8x32xf32>
    %423 = arith.mulf %418, %422 : vector<8x32xf32>
    %cst_100 = arith.constant dense<0.000000e+00> : vector<8x256xf32>
    %424 = tpu.matmul %423, %258, %cst_100 {dimension_numbers = #tpu.dot_dimension_numbers<[1], [0], [0], [1], [0, 0, 1, 1], [], []>} : vector<8x32xf32>, vector<32x256xf32>, vector<8x256xf32> -> vector<8x256xf32>
    %425 = arith.addf %424, %261 : vector<8x256xf32>
    %426 = vector.extract_strided_slice %425 {offsets = [0, 128], sizes = [8, 128], strides = [1, 1]} : vector<8x256xf32> to vector<8x128xf32>
    %427 = arith.index_cast %c4_i32_96 : i32 to index
    %c0_101 = arith.constant 0 : index
    %c0_102 = arith.constant 0 : index
    %428 = vector.load %arg8[%427, %c0_101, %c0_102] : memref<6x8x128xf32, #tpu.memory_space<vmem>>, vector<1x8x128xf32>
    %429 = vector.shape_cast %428 : vector<1x8x128xf32> to vector<8x128xf32>
    %430 = vector.shape_cast %426 : vector<8x128xf32> to vector<1x8x128xf32>
    tpu.vector_store %arg8[%427, %c0_101, %c0_102], %430 {strides = array<i32>} : memref<6x8x128xf32, #tpu.memory_space<vmem>>, vector<1x8x128xf32>,
    %431 = vector.extract_strided_slice %425 {offsets = [0, 0], sizes = [8, 128], strides = [1, 1]} : vector<8x256xf32> to vector<8x128xf32>
    %c5_i32_103 = arith.constant 5 : i32
    %432 = vector.extract_strided_slice %431 {offsets = [0, 0], sizes = [8, 32], strides = [1, 1]} : vector<8x128xf32> to vector<8x32xf32>
    %433 = arith.negf %432 : vector<8x32xf32>
    %434 = math.exp %433 : vector<8x32xf32>
    %cst_104 = arith.constant 1.000000e+00 : f32
    %435 = vector.broadcast %cst_104 : f32 to vector<8x32xf32>
    %436 = arith.addf %435, %434 : vector<8x32xf32>
    %437 = arith.divf %435, %436 : vector<8x32xf32>
    %438 = vector.extract_strided_slice %431 {offsets = [0, 32], sizes = [8, 32], strides = [1, 1]} : vector<8x128xf32> to vector<8x32xf32>
    %439 = arith.negf %438 : vector<8x32xf32>
    %440 = math.exp %439 : vector<8x32xf32>
    %cst_105 = arith.constant 1.000000e+00 : f32
    %441 = vector.broadcast %cst_105 : f32 to vector<8x32xf32>
    %442 = arith.addf %441, %440 : vector<8x32xf32>
    %443 = arith.divf %441, %442 : vector<8x32xf32>
    %444 = vector.extract_strided_slice %431 {offsets = [0, 64], sizes = [8, 32], strides = [1, 1]} : vector<8x128xf32> to vector<8x32xf32>
    %445 = math.tanh %444 : vector<8x32xf32>
    %446 = vector.extract_strided_slice %431 {offsets = [0, 96], sizes = [8, 32], strides = [1, 1]} : vector<8x128xf32> to vector<8x32xf32>
    %447 = arith.negf %446 : vector<8x32xf32>
    %448 = math.exp %447 : vector<8x32xf32>
    %cst_106 = arith.constant 1.000000e+00 : f32
    %449 = vector.broadcast %cst_106 : f32 to vector<8x32xf32>
    %450 = arith.addf %449, %448 : vector<8x32xf32>
    %451 = arith.divf %449, %450 : vector<8x32xf32>
    %452 = arith.mulf %443, %421 : vector<8x32xf32>
    %453 = arith.mulf %437, %445 : vector<8x32xf32>
    %454 = arith.addf %452, %453 : vector<8x32xf32>
    %455 = math.tanh %454 : vector<8x32xf32>
    %456 = arith.mulf %451, %455 : vector<8x32xf32>
    %cst_107 = arith.constant dense<0.000000e+00> : vector<8x256xf32>
    %457 = tpu.matmul %456, %258, %cst_107 {dimension_numbers = #tpu.dot_dimension_numbers<[1], [0], [0], [1], [0, 0, 1, 1], [], []>} : vector<8x32xf32>, vector<32x256xf32>, vector<8x256xf32> -> vector<8x256xf32>
    %458 = arith.addf %457, %261 : vector<8x256xf32>
    %459 = vector.extract_strided_slice %458 {offsets = [0, 128], sizes = [8, 128], strides = [1, 1]} : vector<8x256xf32> to vector<8x128xf32>
    %460 = arith.index_cast %c5_i32_103 : i32 to index
    %c0_108 = arith.constant 0 : index
    %c0_109 = arith.constant 0 : index
    %461 = vector.load %arg8[%460, %c0_108, %c0_109] : memref<6x8x128xf32, #tpu.memory_space<vmem>>, vector<1x8x128xf32>
    %462 = vector.shape_cast %461 : vector<1x8x128xf32> to vector<8x128xf32>
    %463 = vector.shape_cast %459 : vector<8x128xf32> to vector<1x8x128xf32>
    tpu.vector_store %arg8[%460, %c0_108, %c0_109], %463 {strides = array<i32>} : memref<6x8x128xf32, #tpu.memory_space<vmem>>, vector<1x8x128xf32>,
    %464 = vector.extract_strided_slice %458 {offsets = [0, 0], sizes = [8, 128], strides = [1, 1]} : vector<8x256xf32> to vector<8x128xf32>
    %c6_i32_110 = arith.constant 6 : i32
    return
  }
}

</mosaic_0001>

<bundles_post_ra>
// kernel: feature_recognition_logits.1
= control target key start
LH: loop header
LB: loop body
LE: loop exit
PB: predicated region body
PF: predicated region fallthrough
CT: control target
= control target key end

     0   :  { %v2198_v2 = vmov 0.0|0.0   ;;  %vm52_vm0 = vcmask 261120   ;;  %vm2199_vm1 = vmmov 0   ;;  %v2200_v4 = vmov 0.0   ;;  %s2201_s25 = smov 32   ;;  %s2203_s26 = smov 64   ;;  %s2581_s1 = inlined_call_operand.vmem [shape: f32[32,128], index: 1, kind: input, shape index: {}]   ;;  %s2582_s2 = inlined_call_operand.vmem [shape: f32[32,128], index: 2, kind: input, shape index: {}]   ;;  %s2583_s0 = inlined_call_operand.vmem [shape: f32[64,32], index: 0, kind: input, shape index: {}]   ;;  %s2584_s3 = inlined_call_operand.vmem [shape: f32[1,128], index: 3, kind: input, shape index: {}]   ;;  %s2585_s4 = inlined_call_operand.vmem [shape: f32[32,128], index: 4, kind: input, shape index: {}]   ;;  %s2586_s5 = inlined_call_operand.vmem [shape: f32[1,128], index: 5, kind: input, shape index: {}]   ;;  %s2587_s6 = inlined_call_operand.vmem [shape: f32[32,256], index: 6, kind: input, shape index: {}]   ;;  %s2588_s7 = inlined_call_operand.vmem [shape: f32[1,256], index: 7, kind: input, shape index: {}]   ;;  %s2589_s8 = inlined_call_operand.vmem [shape: f32[6,8,128], index: 8, kind: output, shape index: {}]  }
   0x1   :  { %v41_v0 = vld [vmem:[%s2581_s1] sm:$0xff]  ;;  %v42_v1 = vld [vmem:[%s2581_s1 + $0x8] sm:$0xff]  ;;  %1978 = vmatprep.subr.bf16.mxu1 %v2198_v2  ;;  %1879 = vmatprep.mubr.msk.f32.mxu1 %vm2199_vm1, %v2200_v4  ;;  %v43_v7 = vld [vmem:[%s2581_s1 + $0x10] sm:$0xff] }
   0x2   :  { %v29_v3 = vld [vmem:[%s2582_s2] sm:$0xff]  ;;  %v1970_v5 = vpack.c.bf16 %v42_v1, %v41_v0  ;;  %v30_v6 = vld [vmem:[%s2582_s2 + $0x8] sm:$0xff]  ;;  %v44_v8 = vld [vmem:[%s2581_s1 + $0x18] sm:$0xff] }
   0x3   :  { %v2270_v9 = vpack.c.bf16 %v30_v6, %v29_v3  ;;  %v1974_v10 = vpack.c.bf16 %v44_v8, %v43_v7  ;;  %v33_v11 = vld [vmem:[%s2583_s0] sm:$0xff]  ;;  %v31_v12 = vld [vmem:[%s2582_s2 + $0x10] sm:$0xff]  ;;  %v32_v13 = vld [vmem:[%s2582_s2 + $0x18] sm:$0xff] }
   0x4   :  { %1971 = vmatprep.subr.bf16.mxu0 %v1970_v5  ;;  %1859 = vmatprep.mubr.msk.f32.mxu0 %vm52_vm0, %v33_v11  ;;  %v2283_v14 = vpack.c.bf16 %v32_v13, %v31_v12  ;;  %v34_v15 = vld [vmem:[%s2583_s0 + $0x8] sm:$0xff]  ;;  %v2307_v16 = vld [vmem:[%s2584_s3] ss:$0 sm:$0xff]  ;;  %s2202_s3 = smov 96   ;;  %v35_v52 = vld [vmem:[%s2583_s0 + $0x10] sm:$0xff] }
   0x5   :  { %1973 = vmatpush3.bf16.msra.mxu0 %v1970_v5  ;;  %1980 = vmatpush3.bf16.msra.mxu1 %v2270_v9  ;;  %v36_v53 = vld [vmem:[%s2583_s0 + $0x18] sm:$0xff]  ;;  %v37_v54 = vld [vmem:[%s2583_s0 + $0x20] sm:$0xff]  ;;  %v38_v55 = vld [vmem:[%s2583_s0 + $0x28] sm:$0xff] }
   0x6   :  { %1975 = vmatprep.subr.bf16.mxu0 %v1974_v10  ;;  %1981 = vmatprep.subr.bf16.mxu1 %v2198_v2  ;;  %v39_v56 = vld [vmem:[%s2583_s0 + $0x30] sm:$0xff]  ;;  %v40_v57 = vld [vmem:[%s2583_s0 + $0x38] sm:$0xff] }
   0x9   :  { %1977 = vmatpush3.bf16.msra.mxu0 %v1974_v10  ;;  %1983 = vmatpush3.bf16.msra.mxu1 %v2283_v14 }
   0xa   :  { %1984 = vmatprep.subr.bf16.mxu1 %v2198_v2  ;;  %1990 = vmatprep.subr.bf16.mxu0 %v2198_v2 }
   0xc   :  { %1860 = vmatmul.mubr.msk.f32.vlgmr.msra.gmra.mrb[0].mxu0 %vm52_vm0, %v34_v15  ;;  %1880 = vmatmul.mubr.f32.vlgmr.msra.gmra.mrb[0].mxu1 %v2200_v4 }
   0xd   :  { %1986 = vmatpush3.bf16.msra.mxu1 %v2270_v9  ;;  %1890 = vmatprep.mubr.msk.f32.mxu1 %vm2199_vm1, %v2200_v4 }
   0xe   :  { %1987 = vmatprep.subr.bf16.mxu1 %v2198_v2  ;;  %1992 = vmatpush3.bf16.msra.mxu0 %v2270_v9 }
   0xf   :  { %1993 = vmatprep.subr.bf16.mxu0 %v2198_v2  ;;  %1862 = vmatprep.mubr.msk.f32.mxu0 %vm52_vm0, %v35_v52 }
  0x10   :  { %1863 = vmatmul.mubr.msk.f32.gmra.mrb[2].mxu0 %vm52_vm0, %v36_v53 }
  0x11   :  { %1989 = vmatpush3.bf16.msra.mxu1 %v2283_v14  ;;  %1865 = vmatprep.mubr.msk.f32.mxu0 %vm52_vm0, %v37_v54 }
  0x12   :  { %1995 = vmatpush3.bf16.msra.mxu0 %v2283_v14  ;;  %1996 = vmatprep.subr.bf16.mxu1 %v2198_v2 }
  0x13   :  { %2002 = vmatprep.subr.bf16.mxu0 %v2198_v2 }
  0x14   :  { %1866 = vmatmul.mubr.msk.f32.gmra.mrb[4].mxu0 %vm52_vm0, %v38_v55 }
  0x15   :  { %1868 = vmatprep.mubr.msk.f32.mxu0 %vm52_vm0, %v39_v56 }
  0x18   :  { %1869 = vmatmul.mubr.msk.f32.gmra.mrb[6].mxu0 %vm52_vm0, %v40_v57 }
  0x19   :  { %1901 = vmatprep.mubr.msk.f32.mxu0 %vm2199_vm1, %v2200_v4 }
  0xdf   :  { %v1861_v17 = vpop.f32.mrb[0].mxu0  ;;  %v260_v18 = vpop.f32.mrb[0].mxu1 }
  0xe0   :  { %v143_v19 = vpop.f32.mrb[1].mxu0  ;;  %v1881_v20 = vpop.f32.mrb[1].mxu1  ;;  %v149_v37 = vadd.f32 %v1861_v17, %v2307_v16 }
  0xe1   :  { %v144_v21 = vadd.f32 %v2307_v16, %v143_v19 }
  0xe3   :  { %v264_v22 = vadd.f32 %v260_v18, %v144_v21  ;;  %v1864_v61 = vpop.f32.mrb[2].mxu0 }
  0xe4   :  { %v153_v62 = vpop.f32.mrb[3].mxu0 }
  0xe5   :  { %v1760_v23 = vmul.f32 -1.442695, %v264_v22  ;;  %2086 = vtanh.f32 %v264_v22  ;;  %v154_v6 = vadd.f32 %v2307_v16, %v153_v62 }
  0xe7   :  { %2088 = vpow2.f32 %v1760_v23  ;;  %v2354_v63 = vpop.f32.mrb[4].mxu0 }
  0xe8   :  { %v2356_v0 = vpop.f32.mrb[5].mxu0 }
  0xeb   :  { %v2358_v1 = vpop.f32.mrb[6].mxu0 }
  0xec   :  { %v2360_v3 = vpop.f32.mrb[7].mxu0 }
  0xef   :  { %v2087_v24 = vpop.eup %2086 }
  0xf0   :  { %273 = vrot.lane.b32.xlu0 %v2087_v24, %s2201_s25 }
  0xf1   :  { %v2089_v25 = vpop.eup %2088 }
  0xf2   :  { %v268_v26 = vadd.f32 1.0, %v2089_v25 }
  0xf4   :  { %2090 = vrcp.f32 %v268_v26 }
  0xfe   :  { %v2091_v27 = vpop.eup %2090 }
  0xff   :  { %v277_v28 = vmul.f32 0.0, %v2091_v27 }
 0x101   :  { %279 = vrot.lane.b32.xlu0 %v277_v28, %s2202_s3  ;;  %v159_v28 = vadd.f32 %v1864_v61, %v2307_v16 }
 0x162   :  { %v274_v29 = vpop.permute.xlu0 %273 }
 0x163   :  { %v276_v30 = vmul.f32 %v2091_v27, %v274_v29 }
 0x173   :  { %v280_v31 = vpop.permute.xlu0 %279 }
 0x174   :  { %v282_v32 = vadd.f32 %v280_v31, %v276_v30 }
 0x176   :  { %2092 = vtanh.f32 %v282_v32  ;;  %380 = vrot.lane.b32.xlu0 %v282_v32, %s2201_s25 }
 0x180   :  { %v2093_v33 = vpop.eup %2092 }
 0x181   :  { %285 = vrot.lane.b32.xlu1 %v2093_v33, %s2203_s26 }
 0x1e8   :  { %v381_v46 = vpop.permute.xlu0 %380 }
 0x1f3   :  { %v286_v34 = vpop.permute.xlu1 %285 }
 0x1f4   :  { %v288_v35 = vmul.f32 %v2091_v27, %v286_v34 }
 0x1f6   :  { %292 = vrot.lane.b32.xlu1 %v288_v35, %s2203_s26 }
 0x268   :  { %v293_v36 = vpop.permute.xlu1 %292 }
 0x269   :  { %1891 = vmatmul.mubr.msk.f32.vlgmr.msra.gmra.mrb[2].mxu1 %vm52_vm0, %v293_v36 }
 0x26a   :  { %1998 = vmatpush3.bf16.msra.mxu1 %v2270_v9  ;;  %1912 = vmatprep.mubr.msk.f32.mxu1 %vm2199_vm1, %v2200_v4 }
 0x26b   :  { %1999 = vmatprep.subr.bf16.mxu1 %v2198_v2 }
 0x26e   :  { %2001 = vmatpush3.bf16.msra.mxu1 %v2283_v14 }
 0x26f   :  { %2008 = vmatprep.subr.bf16.mxu1 %v2198_v2 }
 0x33c   :  { %v362_v38 = vpop.f32.mrb[2].mxu1 }
 0x33d   :  { %v366_v39 = vadd.f32 %v362_v38, %v149_v37  ;;  %v1892_v40 = vpop.f32.mrb[3].mxu1 }
 0x33f   :  { %v1762_v41 = vmul.f32 -1.442695, %v366_v39  ;;  %2094 = vtanh.f32 %v366_v39 }
 0x341   :  { %2096 = vpow2.f32 %v1762_v41 }
 0x349   :  { %v2095_v42 = vpop.eup %2094 }
 0x34a   :  { %375 = vrot.lane.b32.xlu1 %v2095_v42, %s2201_s25 }
 0x34b   :  { %v2097_v43 = vpop.eup %2096 }
 0x34c   :  { %v370_v44 = vadd.f32 1.0, %v2097_v43 }
 0x34e   :  { %2098 = vrcp.f32 %v370_v44 }
 0x358   :  { %v2099_v45 = vpop.eup %2098 }
 0x359   :  { %v383_v47 = vmul.f32 %v2099_v45, %v381_v46 }
 0x35b   :  { %385 = vrot.lane.b32.xlu0 %v383_v47, %s2202_s3  ;;  %v164_v47 = vadd.f32 %v2307_v16, %v2356_v0 }
 0x3bc   :  { %v376_v48 = vpop.permute.xlu1 %375 }
 0x3bd   :  { %v378_v49 = vmul.f32 %v2099_v45, %v376_v48 }
 0x3cd   :  { %v386_v50 = vpop.permute.xlu0 %385 }
 0x3ce   :  { %v388_v51 = vadd.f32 %v386_v50, %v378_v49 }
 0x3d0   :  { %2100 = vtanh.f32 %v388_v51 }
 0x3da   :  { %v2101_v58 = vpop.eup %2100 }
 0x3db   :  { %391 = vrot.lane.b32.xlu1 %v2101_v58, %s2203_s26 }
 0x3df   :  { %486 = vrot.lane.b32.xlu1 %v388_v51, %s2201_s25 }
 0x44d   :  { %v392_v59 = vpop.permute.xlu1 %391 }
 0x44e   :  { %v394_v60 = vmul.f32 %v2099_v45, %v392_v59 }
 0x450   :  { %398 = vrot.lane.b32.xlu0 %v394_v60, %s2203_s26 }
 0x451   :  { %v487_v18 = vpop.permute.xlu1 %486 }
 0x4c2   :  { %v399_v5 = vpop.permute.xlu0 %398 }
 0x4c3   :  { %1902 = vmatmul.mubr.msk.f32.vlgmr.msra.gmra.mrb[8].mxu0 %vm52_vm0, %v399_v5 }
 0x4c4   :  { %2004 = vmatpush3.bf16.msra.mxu0 %v2270_v9  ;;  %1923 = vmatprep.mubr.msk.f32.mxu0 %vm2199_vm1, %v2200_v4 }
 0x4c5   :  { %2005 = vmatprep.subr.bf16.mxu0 %v2198_v2 }
 0x4c8   :  { %2007 = vmatpush3.bf16.msra.mxu0 %v2283_v14 }
 0x4c9   :  { %2014 = vmatprep.subr.bf16.mxu0 %v2198_v2 }
 0x596   :  { %v468_v7 = vpop.f32.mrb[8].mxu0 }
 0x597   :  { %v472_v8 = vadd.f32 %v468_v7, %v154_v6  ;;  %v1903_v10 = vpop.f32.mrb[9].mxu0  ;;  %v169_v7 = vadd.f32 %v2354_v63, %v2307_v16 }
 0x599   :  { %v1764_v11 = vmul.f32 -1.442695, %v472_v8  ;;  %2102 = vtanh.f32 %v472_v8 }
 0x59b   :  { %2104 = vpow2.f32 %v1764_v11 }
 0x5a3   :  { %v2103_v12 = vpop.eup %2102 }
 0x5a4   :  { %481 = vrot.lane.b32.xlu0 %v2103_v12, %s2201_s25 }
 0x5a5   :  { %v2105_v13 = vpop.eup %2104 }
 0x5a6   :  { %v476_v15 = vadd.f32 1.0, %v2105_v13 }
 0x5a8   :  { %2106 = vrcp.f32 %v476_v15 }
 0x5b2   :  { %v2107_v17 = vpop.eup %2106 }
 0x5b3   :  { %v489_v19 = vmul.f32 %v2107_v17, %v487_v18 }
 0x5b5   :  { %491 = vrot.lane.b32.xlu1 %v489_v19, %s2202_s3 }
 0x616   :  { %v482_v20 = vpop.permute.xlu0 %481 }
 0x617   :  { %v484_v21 = vmul.f32 %v2107_v17, %v482_v20 }
 0x627   :  { %v492_v22 = vpop.permute.xlu1 %491 }
 0x628   :  { %v494_v23 = vadd.f32 %v492_v22, %v484_v21 }
 0x62a   :  { %2108 = vtanh.f32 %v494_v23 }
 0x634   :  { %v2109_v24 = vpop.eup %2108 }
 0x635   :  { %497 = vrot.lane.b32.xlu0 %v2109_v24, %s2203_s26 }
 0x639   :  { %592 = vrot.lane.b32.xlu0 %v494_v23, %s2201_s25 }
 0x6a7   :  { %v498_v25 = vpop.permute.xlu0 %497 }
 0x6a8   :  { %v500_v26 = vmul.f32 %v2107_v17, %v498_v25 }
 0x6aa   :  { %504 = vrot.lane.b32.xlu1 %v500_v26, %s2203_s26  ;;  %v174_v26 = vadd.f32 %v2307_v16, %v2360_v3 }
 0x6ab   :  { %v593_v37 = vpop.permute.xlu0 %592 }
 0x71c   :  { %v505_v27 = vpop.permute.xlu1 %504 }
 0x71d   :  { %1913 = vmatmul.mubr.msk.f32.vlgmr.msra.gmra.mrb[4].mxu1 %vm52_vm0, %v505_v27 }
 0x71e   :  { %2010 = vmatpush3.bf16.msra.mxu1 %v2270_v9  ;;  %1934 = vmatprep.mubr.msk.f32.mxu1 %vm2199_vm1, %v2200_v4 }
 0x71f   :  { %2011 = vmatprep.subr.bf16.mxu1 %v2198_v2 }
 0x722   :  { %2013 = vmatpush3.bf16.msra.mxu1 %v2283_v14 }
 0x723   :  { %2020 = vmatprep.subr.bf16.mxu1 %v2198_v2 }
 0x7f0   :  { %v574_v29 = vpop.f32.mrb[4].mxu1 }
 0x7f1   :  { %v578_v30 = vadd.f32 %v574_v29, %v159_v28  ;;  %v1914_v31 = vpop.f32.mrb[5].mxu1 }
 0x7f3   :  { %v1766_v32 = vmul.f32 -1.442695, %v578_v30  ;;  %2110 = vtanh.f32 %v578_v30 }
 0x7f5   :  { %2112 = vpow2.f32 %v1766_v32 }
 0x7fd   :  { %v2111_v33 = vpop.eup %2110 }
 0x7fe   :  { %587 = vrot.lane.b32.xlu1 %v2111_v33, %s2201_s25 }
 0x7ff   :  { %v2113_v34 = vpop.eup %2112 }
 0x800   :  { %v582_v35 = vadd.f32 1.0, %v2113_v34 }
 0x802   :  { %2114 = vrcp.f32 %v582_v35 }
 0x80c   :  { %v2115_v36 = vpop.eup %2114 }
 0x80d   :  { %v595_v38 = vmul.f32 %v2115_v36, %v593_v37 }
 0x80f   :  { %597 = vrot.lane.b32.xlu0 %v595_v38, %s2202_s3 }
 0x870   :  { %v588_v39 = vpop.permute.xlu1 %587 }
 0x871   :  { %v590_v40 = vmul.f32 %v2115_v36, %v588_v39 }
 0x881   :  { %v598_v41 = vpop.permute.xlu0 %597 }
 0x882   :  { %v600_v42 = vadd.f32 %v598_v41, %v590_v40 }
 0x884   :  { %2116 = vtanh.f32 %v600_v42 }
 0x88e   :  { %v2117_v43 = vpop.eup %2116 }
 0x88f   :  { %603 = vrot.lane.b32.xlu1 %v2117_v43, %s2203_s26 }
 0x893   :  { %698 = vrot.lane.b32.xlu1 %v600_v42, %s2201_s25 }
 0x901   :  { %v604_v44 = vpop.permute.xlu1 %603 }
 0x902   :  { %v606_v45 = vmul.f32 %v2115_v36, %v604_v44  ;;  %v179_v44 = vadd.f32 %v2358_v1, %v2307_v16 }
 0x904   :  { %610 = vrot.lane.b32.xlu0 %v606_v45, %s2203_s26 }
 0x905   :  { %v699_v56 = vpop.permute.xlu1 %698 }
 0x976   :  { %v611_v46 = vpop.permute.xlu0 %610 }
 0x977   :  { %1924 = vmatmul.mubr.msk.f32.vlgmr.msra.gmra.mrb[10].mxu0 %vm52_vm0, %v611_v46 }
 0x978   :  { %2016 = vmatpush3.bf16.msra.mxu0 %v2270_v9  ;;  %1945 = vmatprep.mubr.msk.f32.mxu0 %vm2199_vm1, %v2200_v4 }
 0x979   :  { %2017 = vmatprep.subr.bf16.mxu0 %v2198_v2 }
 0x97c   :  { %2019 = vmatpush3.bf16.msra.mxu0 %v2283_v14 }
 0x97d   :  { %2026 = vmatprep.subr.bf16.mxu0 %v2198_v2 }
 0xa4a   :  { %v680_v48 = vpop.f32.mrb[10].mxu0 }
 0xa4b   :  { %v684_v49 = vadd.f32 %v680_v48, %v164_v47  ;;  %v1925_v50 = vpop.f32.mrb[11].mxu0 }
 0xa4d   :  { %v1768_v51 = vmul.f32 -1.442695, %v684_v49  ;;  %2118 = vtanh.f32 %v684_v49 }
 0xa4f   :  { %2120 = vpow2.f32 %v1768_v51 }
 0xa57   :  { %v2119_v52 = vpop.eup %2118 }
 0xa58   :  { %693 = vrot.lane.b32.xlu0 %v2119_v52, %s2201_s25 }
 0xa59   :  { %v2121_v53 = vpop.eup %2120 }
 0xa5a   :  { %v688_v54 = vadd.f32 1.0, %v2121_v53 }
 0xa5c   :  { %2122 = vrcp.f32 %v688_v54 }
 0xa66   :  { %v2123_v55 = vpop.eup %2122 }
 0xa67   :  { %v701_v57 = vmul.f32 %v2123_v55, %v699_v56 }
 0xa69   :  { %703 = vrot.lane.b32.xlu1 %v701_v57, %s2202_s3  ;;  %v1051_v57 = vld [vmem:[%s2585_s4] sm:$0xff] }
 0xaca   :  { %v694_v58 = vpop.permute.xlu0 %693 }
 0xacb   :  { %v696_v59 = vmul.f32 %v2123_v55, %v694_v58  ;;  %v1052_v58 = vld [vmem:[%s2585_s4 + $0x8] sm:$0xff] }
 0xadb   :  { %v704_v60 = vpop.permute.xlu1 %703 }
 0xadc   :  { %v706_v61 = vadd.f32 %v704_v60, %v696_v59  ;;  %v1053_v59 = vld [vmem:[%s2585_s4 + $0x10] sm:$0xff]  ;;  %v2027_v60 = vpack.c.bf16 %v1052_v58, %v1051_v57 }
 0xade   :  { %2124 = vtanh.f32 %v706_v61 }
 0xae8   :  { %v2125_v62 = vpop.eup %2124 }
 0xae9   :  { %709 = vrot.lane.b32.xlu0 %v2125_v62, %s2203_s26 }
 0xaed   :  { %804 = vrot.lane.b32.xlu0 %v706_v61, %s2201_s25  ;;  %v1054_v61 = vld [vmem:[%s2585_s4 + $0x18] sm:$0xff] }
 0xaee   :  { %v2030_v62 = vpack.c.bf16 %v1054_v61, %v1053_v59 }
 0xb5b   :  { %v710_v0 = vpop.permute.xlu0 %709 }
 0xb5c   :  { %v712_v5 = vmul.f32 %v2123_v55, %v710_v0 }
 0xb5e   :  { %716 = vrot.lane.b32.xlu1 %v712_v5, %s2203_s26 }
 0xb5f   :  { %v805_v18 = vpop.permute.xlu0 %804 }
 0xbd0   :  { %v717_v6 = vpop.permute.xlu1 %716 }
 0xbd1   :  { %1935 = vmatmul.mubr.msk.f32.vlgmr.msra.gmra.mrb[6].mxu1 %vm52_vm0, %v717_v6 }
 0xbd2   :  { %2022 = vmatpush3.bf16.msra.mxu1 %v2270_v9  ;;  %1956 = vmatprep.mubr.msk.f32.mxu1 %vm2199_vm1, %v2200_v4 }
 0xbd3   :  { %2023 = vmatprep.subr.bf16.mxu1 %v2198_v2 }
 0xbd6   :  { %2025 = vmatpush3.bf16.msra.mxu1 %v2283_v14 }
 0xca4   :  { %v786_v8 = vpop.f32.mrb[6].mxu1 }
 0xca5   :  { %v790_v10 = vadd.f32 %v786_v8, %v169_v7  ;;  %v1936_v11 = vpop.f32.mrb[7].mxu1  ;;  %v1775_v8 = vld [vmem:[%s2586_s5] ss:$0 sm:$0xff] }
 0xca7   :  { %v1770_v12 = vmul.f32 -1.442695, %v790_v10  ;;  %2126 = vtanh.f32 %v790_v10 }
 0xca9   :  { %2128 = vpow2.f32 %v1770_v12 }
 0xcb1   :  { %v2127_v13 = vpop.eup %2126 }
 0xcb2   :  { %799 = vrot.lane.b32.xlu1 %v2127_v13, %s2201_s25 }
 0xcb3   :  { %v2129_v9 = vpop.eup %2128 }
 0xcb4   :  { %v794_v15 = vadd.f32 1.0, %v2129_v9 }
 0xcb6   :  { %2130 = vrcp.f32 %v794_v15 }
 0xcc0   :  { %v2131_v17 = vpop.eup %2130 }
 0xcc1   :  { %v807_v19 = vmul.f32 %v2131_v17, %v805_v18 }
 0xcc3   :  { %809 = vrot.lane.b32.xlu0 %v807_v19, %s2202_s3 }
 0xd24   :  { %v800_v14 = vpop.permute.xlu1 %799 }
 0xd25   :  { %v802_v20 = vmul.f32 %v2131_v17, %v800_v14 }
 0xd35   :  { %v810_v63 = vpop.permute.xlu0 %809 }
 0xd36   :  { %v812_v21 = vadd.f32 %v810_v63, %v802_v20 }
 0xd38   :  { %2132 = vtanh.f32 %v812_v21 }
 0xd42   :  { %v2133_v22 = vpop.eup %2132 }
 0xd43   :  { %815 = vrot.lane.b32.xlu1 %v2133_v22, %s2203_s26  ;;  %v1034_v22 = vld [vmem:[%s2587_s6 + $0x18] sm:$0xff] }
 0xd47   :  { %910 = vrot.lane.b32.xlu1 %v812_v21, %s2201_s25  ;;  %v1032_v21 = vld [vmem:[%s2587_s6 + $0x8] sm:$0xff] }
 0xdb5   :  { %v816_v23 = vpop.permute.xlu1 %815 }
 0xdb6   :  { %v818_v24 = vmul.f32 %v2131_v17, %v816_v23  ;;  %v1031_v23 = vld [vmem:[%s2587_s6] sm:$0xff] }
 0xdb8   :  { %822 = vrot.lane.b32.xlu0 %v818_v24, %s2203_s26  ;;  %v2465_v24 = vpack.c.bf16 %v1034_v22, %v1032_v21 }
 0xdb9   :  { %v911_v35 = vpop.permute.xlu1 %910 }
 0xdba   :  { %2033 = vmatprep.subr.bf16.mxu1 %v2465_v24 }
 0xe2a   :  { %v823_v25 = vpop.permute.xlu0 %822 }
 0xe2b   :  { %1946 = vmatmul.mubr.msk.f32.vlgmr.msra.gmra.mrb[12].mxu0 %vm52_vm0, %v823_v25  ;;  %v1033_v25 = vld [vmem:[%s2587_s6 + $0x10] sm:$0xff] }
 0xe2c   :  { %1967 = vmatprep.mubr.msk.f32.mxu0 %vm2199_vm1, %v2200_v4  ;;  %2028 = vmatpush3.bf16.msra.mxu0 %v2027_v60 }
 0xe2d   :  { %2029 = vmatprep.subr.bf16.mxu0 %v2198_v2 }
 0xe30   :  { %2031 = vmatpush3.bf16.msra.mxu0 %v2030_v62 }
 0xe31   :  { %2041 = vmatprep.subr.bf16.mxu0 %v2465_v24 }
 0xefe   :  { %v892_v27 = vpop.f32.mrb[12].mxu0 }
 0xeff   :  { %v896_v28 = vadd.f32 %v892_v27, %v174_v26  ;;  %v1947_v29 = vpop.f32.mrb[13].mxu0  ;;  %v1036_v26 = vld [vmem:[%s2587_s6 + $0x28] sm:$0xff]  ;;  %v1038_v27 = vld [vmem:[%s2587_s6 + $0x38] sm:$0xff] }
 0xf00   :  { %v2478_v29 = vpack.c.bf16 %v1038_v27, %v1036_v26 }
 0xf01   :  { %v1772_v30 = vmul.f32 -1.442695, %v896_v28  ;;  %2134 = vtanh.f32 %v896_v28  ;;  %v2476_v28 = vpack.c.bf16 %v1033_v25, %v1031_v23 }
 0xf03   :  { %2136 = vpow2.f32 %v1772_v30  ;;  %v1035_v30 = vld [vmem:[%s2587_s6 + $0x20] sm:$0xff] }
 0xf0b   :  { %v2135_v31 = vpop.eup %2134 }
 0xf0c   :  { %905 = vrot.lane.b32.xlu0 %v2135_v31, %s2201_s25  ;;  %v1037_v31 = vld [vmem:[%s2587_s6 + $0x30] sm:$0xff] }
 0xf0d   :  { %v2137_v32 = vpop.eup %2136 }
 0xf0e   :  { %v900_v33 = vadd.f32 1.0, %v2137_v32  ;;  %v2489_v32 = vpack.c.bf16 %v1037_v31, %v1035_v30 }
 0xf10   :  { %2138 = vrcp.f32 %v900_v33 }
 0xf1a   :  { %v2139_v34 = vpop.eup %2138 }
 0xf1b   :  { %v913_v36 = vmul.f32 %v2139_v34, %v911_v35 }
 0xf1d   :  { %915 = vrot.lane.b32.xlu1 %v913_v36, %s2202_s3 }
 0xf7e   :  { %v906_v37 = vpop.permute.xlu0 %905 }
 0xf7f   :  { %v908_v38 = vmul.f32 %v2139_v34, %v906_v37  ;;  %v1041_v37 = vlaneseq }
 0xf8f   :  { %v916_v3 = vpop.permute.xlu1 %915 }
 0xf90   :  { %v918_v39 = vadd.f32 %v916_v3, %v908_v38  ;;  %v1042_v38 = vshrl.u32 %v1041_v37, 7 }
 0xf92   :  { %2140 = vtanh.f32 %v918_v39  ;;  %v1043_v3 = vsub.s32 0, %v1042_v38 }
 0xf9c   :  { %v2141_v40 = vpop.eup %2140 }
 0xf9d   :  { %921 = vrot.lane.b32.xlu0 %v2141_v40, %s2203_s26  ;;  %v1047_v40 = vsub.s32 1, %v1042_v38 }
 0xfa1   :  { %1016 = vrot.lane.b32.xlu0 %v918_v39, %s2201_s25  ;;  %v1039_v39 = vld [vmem:[%s2588_s7] sm:$0x3] }
0x100f   :  { %v922_v41 = vpop.permute.xlu0 %921 }
0x1010   :  { %v924_v42 = vmul.f32 %v2139_v34, %v922_v41  ;;  %v2509_v41 = vrot.slane %v1039_v39, %v1043_v3 }
0x1012   :  { %928 = vrot.lane.b32.xlu1 %v924_v42, %s2203_s26  ;;  %v2511_v42 = vrot.slane %v1039_v39, %v1047_v40 }
0x1013   :  { %v1017_v53 = vpop.permute.xlu0 %1016 }
0x1084   :  { %v929_v43 = vpop.permute.xlu1 %928 }
0x1085   :  { %1957 = vmatmul.mubr.msk.f32.vlgmr.msra.gmra.mrb[8].mxu1 %vm52_vm0, %v929_v43 }
0x1086   :  { %1230 = vmatprep.mubr.f32.mxu1 %v2200_v4  ;;  %2035 = vmatpush1.bf16.msra.mxu1 %v2476_v28 }
0x1087   :  { %2037 = vmatprep.subr.bf16.mxu1 %v2478_v29 }
0x108a   :  { %2039 = vmatpush1.bf16.msra.mxu1 %v2489_v32 }
0x108b   :  { %2049 = vmatprep.subr.bf16.mxu1 %v2465_v24 }
0x1158   :  { %v998_v45 = vpop.f32.mrb[8].mxu1 }
0x1159   :  { %v1002_v46 = vadd.f32 %v998_v45, %v179_v44  ;;  %v1958_v47 = vpop.f32.mrb[9].mxu1 }
0x115b   :  { %v1774_v48 = vmul.f32 -1.442695, %v1002_v46  ;;  %2142 = vtanh.f32 %v1002_v46 }
0x115d   :  { %2144 = vpow2.f32 %v1774_v48 }
0x1165   :  { %v2143_v49 = vpop.eup %2142 }
0x1166   :  { %1011 = vrot.lane.b32.xlu1 %v2143_v49, %s2201_s25 }
0x1167   :  { %v2145_v50 = vpop.eup %2144 }
0x1168   :  { %v1006_v51 = vadd.f32 1.0, %v2145_v50 }
0x116a   :  { %2146 = vrcp.f32 %v1006_v51 }
0x1174   :  { %v2147_v52 = vpop.eup %2146 }
0x1175   :  { %v1019_v54 = vmul.f32 %v2147_v52, %v1017_v53 }
0x1177   :  { %1021 = vrot.lane.b32.xlu0 %v1019_v54, %s2202_s3 }
0x11d8   :  { %v1012_v55 = vpop.permute.xlu1 %1011 }
0x11d9   :  { %v1014_v56 = vmul.f32 %v2147_v52, %v1012_v55 }
0x11e9   :  { %v1022_v16 = vpop.permute.xlu0 %1021 }
0x11ea   :  { %v1024_v1 = vadd.f32 %v1022_v16, %v1014_v56 }
0x11ec   :  { %2148 = vtanh.f32 %v1024_v1 }
0x11f6   :  { %v2149_v0 = vpop.eup %2148 }
0x11f7   :  { %1027 = vrot.lane.b32.xlu1 %v2149_v0, %s2203_s26 }
0x1269   :  { %v1028_v5 = vpop.permute.xlu1 %1027 }
0x126a   :  { %v1030_v6 = vmul.f32 %v2147_v52, %v1028_v5 }
0x126c   :  { %1063 = vrot.lane.b32.xlu0 %v1030_v6, %s2203_s26 }
0x12de   :  { %v1064_v7 = vpop.permute.xlu0 %1063 }
0x12df   :  { %1968 = vmatmul.mubr.msk.f32.vlgmr.msra.gmra.mrb[14].mxu0 %vm52_vm0, %v1064_v7 }
0x12e0   :  { %1331 = vmatprep.mubr.f32.mxu0 %v2200_v4  ;;  %2043 = vmatpush1.bf16.msra.mxu0 %v2476_v28 }
0x12e1   :  { %2045 = vmatprep.subr.bf16.mxu0 %v2478_v29 }
0x12e4   :  { %2047 = vmatpush1.bf16.msra.mxu0 %v2489_v32 }
0x12e5   :  { %2057 = vmatprep.subr.bf16.mxu0 %v2465_v24 }
0x13b2   :  { %v1133_v10 = vpop.f32.mrb[14].mxu0 }
0x13b3   :  { %v1134_v11 = vadd.f32 %v1775_v8, %v1133_v10  ;;  %v1969_v2 = vpop.f32.mrb[15].mxu0 }
0x13b5   :  { %2150 = vtanh.f32 %v1134_v11  ;;  %v1777_v13 = vmul.f32 -1.442695, %v1134_v11 }
0x13b7   :  { %2152 = vpow2.f32 %v1777_v13 }
0x13bf   :  { %v2151_v12 = vpop.eup %2150 }
0x13c0   :  { %1146 = vrot.lane.b32.xlu1 %v2151_v12, %s2203_s26 }
0x13c1   :  { %v2153_v9 = vpop.eup %2152 }
0x13c2   :  { %v1140_v15 = vadd.f32 1.0, %v2153_v9 }
0x13c4   :  { %2154 = vrcp.f32 %v1140_v15 }
0x13ce   :  { %v2155_v17 = vpop.eup %2154 }
0x13cf   :  { %v1144_v14 = vmul.f32 0.0, %v2155_v17 }
0x1432   :  { %v1147_v18 = vpop.permute.xlu1 %1146 }
0x1433   :  { %v1149_v19 = vmul.f32 %v2155_v17, %v1147_v18 }
0x1435   :  { %1151 = vrot.lane.b32.xlu0 %v1149_v19, %s2201_s25 }
0x14a7   :  { %v1152_v20 = vpop.permute.xlu0 %1151 }
0x14a8   :  { %v2453_v63 = vadd.f32 %v1152_v20, %v1144_v14 }
0x14aa   :  { %2156 = vtanh.f32 %v2453_v63 }
0x14b4   :  { %v2157_v33 = vpop.eup %2156 }
0x14b5   :  { %1157 = vrot.lane.b32.xlu1 %v2157_v33, %s2203_s26 }
0x1527   :  { %v1158_v34 = vpop.permute.xlu1 %1157 }
0x1528   :  { %v1160_v35 = vmul.f32 %v2155_v17, %v1158_v34 }
0x152a   :  { %1162 = vrot.lane.b32.xlu0 %v1160_v35, %s2201_s25 }
0x159c   :  { %v1163_v36 = vpop.permute.xlu0 %1162 }
0x159d   :  { %1778 = vmatmul.mubr.msk.f32.vlgmr.msra.gmra.mrb[10].mxu1 %vm52_vm0, %v1163_v36 }
0x159e   :  { %2051 = vmatpush1.bf16.msra.mxu1 %v2476_v28  ;;  %1433 = vmatprep.mubr.f32.mxu1 %v2200_v4 }
0x159f   :  { %2053 = vmatprep.subr.bf16.mxu1 %v2478_v29 }
0x15a2   :  { %2055 = vmatpush1.bf16.msra.mxu1 %v2489_v32 }
0x15a3   :  { %2065 = vmatprep.subr.bf16.mxu1 %v2465_v24 }
0x1670   :  { %v1232_v43 = vpop.f32.mrb[10].mxu1 }
0x1671   :  { %v1233_v44 = vadd.f32 %v1232_v43, %v2509_v41  ;;  %v1234_v45 = vpop.f32.mrb[11].mxu1 }
0x1672   :  { %v1235_v46 = vadd.f32 %v1234_v45, %v2511_v42 }
0x1673   :  { %2158 = vtanh.f32 %v1233_v44  ;;  %v1779_v48 = vmul.f32 -1.442695, %v1233_v44 }
0x1674   :  { %1237 = vst [vmem:[%s2589_s8] sm:$0xff] %v1235_v46 }
0x1675   :  { %2160 = vpow2.f32 %v1779_v48 }
0x167d   :  { %v2159_v47 = vpop.eup %2158 }
0x167e   :  { %1247 = vrot.lane.b32.xlu1 %v2159_v47, %s2203_s26 }
0x167f   :  { %v2161_v49 = vpop.eup %2160 }
0x1680   :  { %v1241_v50 = vadd.f32 1.0, %v2161_v49 }
0x1682   :  { %2162 = vrcp.f32 %v1241_v50 }
0x168c   :  { %v2163_v51 = vpop.eup %2162 }
0x168d   :  { %v1245_v54 = vmul.f32 %v2163_v51, %v2453_v63 }
0x16f0   :  { %v1248_v52 = vpop.permute.xlu1 %1247 }
0x16f1   :  { %v1250_v53 = vmul.f32 %v2163_v51, %v1248_v52 }
0x16f3   :  { %1252 = vrot.lane.b32.xlu0 %v1250_v53, %s2201_s25 }
0x1765   :  { %v1253_v55 = vpop.permute.xlu0 %1252 }
0x1766   :  { %v1255_v56 = vadd.f32 %v1253_v55, %v1245_v54 }
0x1768   :  { %2164 = vtanh.f32 %v1255_v56 }
0x1772   :  { %v2165_v16 = vpop.eup %2164 }
0x1773   :  { %1258 = vrot.lane.b32.xlu1 %v2165_v16, %s2203_s26 }
0x17e5   :  { %v1259_v1 = vpop.permute.xlu1 %1258 }
0x17e6   :  { %v1261_v57 = vmul.f32 %v2163_v51, %v1259_v1 }
0x17e8   :  { %1263 = vrot.lane.b32.xlu0 %v1261_v57, %s2201_s25 }
0x185a   :  { %v1264_v58 = vpop.permute.xlu0 %1263 }
0x185b   :  { %1780 = vmatmul.mubr.msk.f32.vlgmr.msra.gmra.mrb[16].mxu0 %vm52_vm0, %v1264_v58 }
0x185c   :  { %2059 = vmatpush1.bf16.msra.mxu0 %v2476_v28  ;;  %1535 = vmatprep.mubr.f32.mxu0 %v2200_v4 }
0x185d   :  { %2061 = vmatprep.subr.bf16.mxu0 %v2478_v29 }
0x1860   :  { %2063 = vmatpush1.bf16.msra.mxu0 %v2489_v32 }
0x1861   :  { %2073 = vmatprep.subr.bf16.mxu0 %v2465_v24 }
0x192e   :  { %v1333_v59 = vpop.f32.mrb[16].mxu0 }
0x192f   :  { %v1334_v60 = vadd.f32 %v1333_v59, %v2509_v41  ;;  %v1335_v61 = vpop.f32.mrb[17].mxu0 }
0x1930   :  { %v1336_v62 = vadd.f32 %v1335_v61, %v2511_v42 }
0x1931   :  { %2166 = vtanh.f32 %v1334_v60  ;;  %v1782_v5 = vmul.f32 -1.442695, %v1334_v60 }
0x1932   :  { %1781 = vst [vmem:[%s2589_s8 + $0x8] sm:$0xff] %v1336_v62 }
0x1933   :  { %2168 = vpow2.f32 %v1782_v5 }
0x193b   :  { %v2167_v0 = vpop.eup %2166 }
0x193c   :  { %1349 = vrot.lane.b32.xlu1 %v2167_v0, %s2203_s26 }
0x193d   :  { %v2169_v6 = vpop.eup %2168 }
0x193e   :  { %v1343_v7 = vadd.f32 1.0, %v2169_v6 }
0x1940   :  { %2170 = vrcp.f32 %v1343_v7 }
0x194a   :  { %v2171_v8 = vpop.eup %2170 }
0x194b   :  { %v1347_v2 = vmul.f32 %v2171_v8, %v1255_v56 }
0x19ae   :  { %v1350_v10 = vpop.permute.xlu1 %1349 }
0x19af   :  { %v1352_v11 = vmul.f32 %v2171_v8, %v1350_v10 }
0x19b1   :  { %1354 = vrot.lane.b32.xlu0 %v1352_v11, %s2201_s25 }
0x1a23   :  { %v1355_v12 = vpop.permute.xlu0 %1354 }
0x1a24   :  { %v1357_v13 = vadd.f32 %v1355_v12, %v1347_v2 }
0x1a26   :  { %2172 = vtanh.f32 %v1357_v13 }
0x1a30   :  { %v2173_v9 = vpop.eup %2172 }
0x1a31   :  { %1360 = vrot.lane.b32.xlu1 %v2173_v9, %s2203_s26 }
0x1aa3   :  { %v1361_v15 = vpop.permute.xlu1 %1360 }
0x1aa4   :  { %v1363_v17 = vmul.f32 %v2171_v8, %v1361_v15 }
0x1aa6   :  { %1365 = vrot.lane.b32.xlu0 %v1363_v17, %s2201_s25 }
0x1b18   :  { %v1366_v18 = vpop.permute.xlu0 %1365 }
0x1b19   :  { %1783 = vmatmul.mubr.msk.f32.vlgmr.msra.gmra.mrb[12].mxu1 %vm52_vm0, %v1366_v18 }
0x1b1a   :  { %2067 = vmatpush1.bf16.msra.mxu1 %v2476_v28  ;;  %1637 = vmatprep.mubr.f32.mxu1 %v2200_v4 }
0x1b1b   :  { %2069 = vmatprep.subr.bf16.mxu1 %v2478_v29 }
0x1b1e   :  { %2071 = vmatpush1.bf16.msra.mxu1 %v2489_v32 }
0x1bec   :  { %v1435_v19 = vpop.f32.mrb[12].mxu1 }
0x1bed   :  { %v1436_v14 = vadd.f32 %v1435_v19, %v2509_v41  ;;  %v1437_v20 = vpop.f32.mrb[13].mxu1 }
0x1bee   :  { %v1438_v63 = vadd.f32 %v1437_v20, %v2511_v42 }
0x1bef   :  { %2174 = vtanh.f32 %v1436_v14  ;;  %v1785_v22 = vmul.f32 -1.442695, %v1436_v14 }
0x1bf0   :  { %1784 = vst [vmem:[%s2589_s8 + $0x10] sm:$0xff] %v1438_v63 }
0x1bf1   :  { %2176 = vpow2.f32 %v1785_v22 }
0x1bf9   :  { %v2175_v21 = vpop.eup %2174 }
0x1bfa   :  { %1451 = vrot.lane.b32.xlu1 %v2175_v21, %s2203_s26 }
0x1bfb   :  { %v2177_v23 = vpop.eup %2176 }
0x1bfc   :  { %v1445_v24 = vadd.f32 1.0, %v2177_v23 }
0x1bfe   :  { %2178 = vrcp.f32 %v1445_v24 }
0x1c08   :  { %v2179_v25 = vpop.eup %2178 }
0x1c09   :  { %v1449_v30 = vmul.f32 %v2179_v25, %v1357_v13 }
0x1c6c   :  { %v1452_v26 = vpop.permute.xlu1 %1451 }
0x1c6d   :  { %v1454_v27 = vmul.f32 %v2179_v25, %v1452_v26 }
0x1c6f   :  { %1456 = vrot.lane.b32.xlu0 %v1454_v27, %s2201_s25 }
0x1ce1   :  { %v1457_v31 = vpop.permute.xlu0 %1456 }
0x1ce2   :  { %v1459_v33 = vadd.f32 %v1457_v31, %v1449_v30 }
0x1ce4   :  { %2180 = vtanh.f32 %v1459_v33 }
0x1cee   :  { %v2181_v34 = vpop.eup %2180 }
0x1cef   :  { %1462 = vrot.lane.b32.xlu1 %v2181_v34, %s2203_s26 }
0x1d61   :  { %v1463_v35 = vpop.permute.xlu1 %1462 }
0x1d62   :  { %v1465_v36 = vmul.f32 %v2179_v25, %v1463_v35 }
0x1d64   :  { %1467 = vrot.lane.b32.xlu0 %v1465_v36, %s2201_s25 }
0x1dd6   :  { %v1468_v37 = vpop.permute.xlu0 %1467 }
0x1dd7   :  { %1786 = vmatmul.mubr.msk.f32.vlgmr.msra.gmra.mrb[18].mxu0 %vm52_vm0, %v1468_v37 }
0x1dd8   :  { %2075 = vmatpush1.bf16.msra.mxu0 %v2476_v28  ;;  %1739 = vmatprep.mubr.f32.mxu0 %v2200_v4 }
0x1dd9   :  { %2077 = vmatprep.subr.bf16.mxu0 %v2478_v29 }
0x1ddc   :  { %2079 = vmatpush1.bf16.msra.mxu0 %v2489_v32 }
0x1eaa   :  { %v1537_v38 = vpop.f32.mrb[18].mxu0 }
0x1eab   :  { %v1538_v3 = vadd.f32 %v1537_v38, %v2509_v41  ;;  %v1539_v39 = vpop.f32.mrb[19].mxu0 }
0x1eac   :  { %v1540_v40 = vadd.f32 %v1539_v39, %v2511_v42 }
0x1ead   :  { %2182 = vtanh.f32 %v1538_v3  ;;  %v1788_v28 = vmul.f32 -1.442695, %v1538_v3 }
0x1eae   :  { %1787 = vst [vmem:[%s2589_s8 + $0x18] sm:$0xff] %v1540_v40 }
0x1eaf   :  { %2184 = vpow2.f32 %v1788_v28 }
0x1eb7   :  { %v2183_v43 = vpop.eup %2182 }
0x1eb8   :  { %1553 = vrot.lane.b32.xlu1 %v2183_v43, %s2203_s26 }
0x1eb9   :  { %v2185_v4 = vpop.eup %2184 }
0x1eba   :  { %v1547_v29 = vadd.f32 1.0, %v2185_v4 }
0x1ebc   :  { %2186 = vrcp.f32 %v1547_v29 }
0x1ec6   :  { %v2187_v32 = vpop.eup %2186 }
0x1ec7   :  { %v1551_v46 = vmul.f32 %v2187_v32, %v1459_v33 }
0x1f2a   :  { %v1554_v44 = vpop.permute.xlu1 %1553 }
0x1f2b   :  { %v1556_v45 = vmul.f32 %v2187_v32, %v1554_v44 }
0x1f2d   :  { %1558 = vrot.lane.b32.xlu0 %v1556_v45, %s2201_s25 }
0x1f9f   :  { %v1559_v47 = vpop.permute.xlu0 %1558 }
0x1fa0   :  { %v1561_v48 = vadd.f32 %v1559_v47, %v1551_v46 }
0x1fa2   :  { %2188 = vtanh.f32 %v1561_v48 }
0x1fac   :  { %v2189_v49 = vpop.eup %2188 }
0x1fad   :  { %1564 = vrot.lane.b32.xlu1 %v2189_v49, %s2203_s26 }
0x201f   :  { %v1565_v50 = vpop.permute.xlu1 %1564 }
0x2020   :  { %v1567_v51 = vmul.f32 %v2187_v32, %v1565_v50 }
0x2022   :  { %1569 = vrot.lane.b32.xlu0 %v1567_v51, %s2201_s25 }
0x2094   :  { %v1570_v52 = vpop.permute.xlu0 %1569 }
0x2095   :  { %1789 = vmatmul.mubr.msk.f32.vlgmr.msra.gmra.mrb[14].mxu1 %vm52_vm0, %v1570_v52 }
0x2168   :  { %v1639_v53 = vpop.f32.mrb[14].mxu1 }
0x2169   :  { %v1640_v54 = vadd.f32 %v1639_v53, %v2509_v41  ;;  %v1641_v55 = vpop.f32.mrb[15].mxu1 }
0x216a   :  { %v1642_v56 = vadd.f32 %v1641_v55, %v2511_v42 }
0x216b   :  { %2190 = vtanh.f32 %v1640_v54  ;;  %v1791_v1 = vmul.f32 -1.442695, %v1640_v54 }
0x216c   :  { %1790 = vst [vmem:[%s2589_s8 + $0x20] sm:$0xff] %v1642_v56 }
0x216d   :  { %2192 = vpow2.f32 %v1791_v1 }
0x2175   :  { %v2191_v16 = vpop.eup %2190 }
0x2176   :  { %1655 = vrot.lane.b32.xlu1 %v2191_v16, %s2203_s26 }
0x2177   :  { %v2193_v57 = vpop.eup %2192 }
0x2178   :  { %v1649_v58 = vadd.f32 1.0, %v2193_v57 }
0x217a   :  { %2194 = vrcp.f32 %v1649_v58 }
0x2184   :  { %v2195_v59 = vpop.eup %2194 }
0x2185   :  { %v1653_v41 = vmul.f32 %v2195_v59, %v1561_v48 }
0x21e8   :  { %v1656_v60 = vpop.permute.xlu1 %1655 }
0x21e9   :  { %v1658_v61 = vmul.f32 %v2195_v59, %v1656_v60 }
0x21eb   :  { %1660 = vrot.lane.b32.xlu0 %v1658_v61, %s2201_s25 }
0x225d   :  { %v1661_v62 = vpop.permute.xlu0 %1660 }
0x225e   :  { %v1663_v0 = vadd.f32 %v1661_v62, %v1653_v41 }
0x2260   :  { %2196 = vtanh.f32 %v1663_v0 }
0x226a   :  { %v2197_v5 = vpop.eup %2196 }
0x226b   :  { %1666 = vrot.lane.b32.xlu1 %v2197_v5, %s2203_s26 }
0x22dd   :  { %v1667_v6 = vpop.permute.xlu1 %1666 }
0x22de   :  { %v1669_v7 = vmul.f32 %v2195_v59, %v1667_v6 }
0x22e0   :  { %1671 = vrot.lane.b32.xlu0 %v1669_v7, %s2201_s25 }
0x2352   :  { %v1672_v8 = vpop.permute.xlu0 %1671 }
0x2353   :  { %1792 = vmatmul.mubr.msk.f32.vlgmr.msra.gmra.mrb[20].mxu0 %vm52_vm0, %v1672_v8 }
0x2426   :  { %v1741_v10 = vpop.f32.mrb[20].mxu0 }
0x2427   :  { %v1742_v11 = vpop.f32.mrb[21].mxu0 }
0x2428   :  { %v1743_v2 = vadd.f32 %v1742_v11, %v2511_v42 }
0x242a   :  { %1793 = vst [vmem:[%s2589_s8 + $0x28] sm:$0xff] %v1743_v2 }

</bundles_post_ra>
